<compile_context>
chip_gen: v7x
topology: tpu7x:2x2x1
jax: 0.10.0
libtpu: 0.0.40
codegen_flags: <defaults>
</compile_context>

<pallas_src>
import functools
import math

import jax
import jax.numpy as jnp
from jax.experimental import pallas as pl
from jax.experimental.pallas import tpu as pltpu


def _round_up(v, m):
    return (v + m - 1) // m * m


def _cov_pool_kernel(f_ref, o_ref, *, n, T, inv_tm1, use_mxu):
    g = f_ref.shape[0]
    x_flat = f_ref[...]                      # (g, n*T) lane-dense tile
    if not use_mxu:
        # Accumulate in f32 on the VPU (v5e has no bf16 VPU path; better numerics on all).
        x_flat = x_flat.astype(jnp.float32)
    # Value relayout (rides the otherwise idle XLU); the DMA itself stays lane-dense.
    x = x_flat.reshape(g, n, T)

    if use_mxu:
        # Large T: contraction dim is big enough for the MXU to be worthwhile.
        acc = jnp.einsum("git,gjt->gij", x, x, preferred_element_type=jnp.float32)
    else:
        # Small T: one tiny MXU matmul per sample would pay a weight push each and use
        # <2% of the array, so do a VPU outer-product accumulation over T instead.
        acc = None
        for t in range(T):                   # static, fully unrolled (T <= 32 here)
            a = x[:, :, t:t + 1]             # (g, n, 1): lane slice, no relayout
            b = x[:, :, t]                   # (g, n):   one sublane->lane relayout per t
            outer = a * b[:, None, :]        # (g, n, n) broadcast multiply on the VPU
            acc = outer if acc is None else acc + outer
        # TODO(synk): symmetry (upper triangle + mirror) would halve the VPU MACs.

    cov = acc * jnp.float32(inv_tm1)         # scale the f32 accumulator, not the operand
    # Lane-dense store: (g, n, n) -> (g, n*n) relayout on the XLU, then a full-width
    # unmasked vst (review: the single biggest documented lever for this kernel).
    o_ref[...] = cov.reshape(g, n * n).astype(o_ref.dtype)


def _vmem_budget_bytes():
    """Per-generation budget for pipeline blocks + compute temporaries, and v7x flag."""
    try:
        kind = jax.devices()[0].device_kind.lower()
    except Exception:
        kind = ""
    if "v7" in kind:
        # v7x: 64 MiB physical / ~32 MiB scoped per TensorCore -> stay around ~20 MiB.
        return 20 << 20, True
    if "v6" in kind:
        # v6e: 128 MiB physical / 32 MiB scoped default -> larger tiles close the roofline gap.
        return 24 << 20, False
    if "v5 lite" in kind or "v5e" in kind:
        # v5e: 16 MiB scoped default -> keep at/below ~12 MiB.
        return 12 << 20, False
    # v4 / v5p / unknown: conservative.
    return 12 << 20, False


def cov_pool(f, reg_mode="mle", *, block_g=1024):
    """JAX/Pallas equivalent of CovPool.forward.

    f: (..., n, T) float -> (..., 1, n, n) float32 with X = f @ f^T / (T - 1).
    """
    # TODO(synk): reg_mode 'add_id' / 'adjust_eig' require a batched eigendecomposition,
    # which has no clean Pallas TPU equivalent; only the default 'mle' mode is implemented.
    assert reg_mode == "mle", "only reg_mode='mle' supported"

    *lead, n, T = f.shape
    assert T >= 2, "cov_pool requires T >= 2 (PyTorch semantics divide by T - 1)"
    bl = math.prod(lead) if lead else 1

    # Lane-dense views: (bl, n*T) in, (bl, n*n) out.  Both reshapes are contiguous (free).
    f_flat = f.reshape(bl, n * T)
    out_dtype = jnp.float32
    inv_tm1 = 1.0 / float(T - 1)
    use_mxu = T > 32

    # ---- choose G (samples per grid step) -------------------------------------------
    itemsize = jnp.dtype(f.dtype).itemsize
    # dtype-aware sublane multiple for the (G, lanes) blocks.
    sub = 8 if itemsize >= 4 else (16 if itemsize == 2 else 32)

    in_row = _round_up(n * T, 128) * itemsize          # per-sample padded input row
    out_row = _round_up(n * n, 128) * 4                # per-sample padded f32 output row
    # In-kernel compute temporaries per sample (lane-padded): f32 x + acc + one outer.
    x_tmp = _round_up(n, 8) * _round_up(T, 128) * 4
    acc_tmp = _round_up(n, 8) * _round_up(n, 128) * 4
    per_sample = 2 * (in_row + out_row) + x_tmp + 2 * acc_tmp   # 2x = double buffering

    vmem_budget, is_v7x = _vmem_budget_bytes()
    g_cap = max(1, vmem_budget // per_sample)
    g = max(1, min(block_g, g_cap, bl))
    if g >= bl:
        g = bl                                   # block dim == array dim is always legal
    else:
        g = max((g // sub) * sub, min(sub, bl))  # split blocks need a sublane multiple
        if g >= bl:
            g = bl

    num_steps = pl.cdiv(bl, g)

    # Megacore (v7x only): aim for an even number of grid steps so the single "parallel"
    # axis load-balances across the 2 TensorCores.  Single-TC chips are never force-split
    # (the grid is a sequential loop there; a split is pure per-step overhead).
    if is_v7x and bl > sub and num_steps % 2 == 1:
        g_try = max(sub, _round_up(pl.cdiv(bl, num_steps + 1), sub))
        if g_try < bl and pl.cdiv(bl, g_try) % 2 == 0:
            g = g_try
            num_steps = pl.cdiv(bl, g)

    kernel = functools.partial(_cov_pool_kernel, n=n, T=T, inv_tm1=inv_tm1, use_mxu=use_mxu)

    out = pl.pallas_call(
        kernel,
        out_shape=jax.ShapeDtypeStruct((bl, n * n), out_dtype),
        grid=(num_steps,),
        in_specs=[pl.BlockSpec((g, n * T), lambda i: (i, 0))],
        out_specs=pl.BlockSpec((g, n * n), lambda i: (i, 0)),
        compiler_params=pltpu.CompilerParams(dimension_semantics=("parallel",)),
    )(f_flat)

    return out.reshape(*lead, 1, n, n)


if __name__ == "__main__":
    key = jax.random.PRNGKey(0)
    k1, k2, k3 = jax.random.split(key, 3)

    def _ref(x):
        T = x.shape[-1]
        return (jnp.einsum("bnt,bmt->bnm", x, x) / (T - 1))[:, None, :, :]

    # 1) Small shape implied by the module: batch=8, n=16 features, T=8 timesteps
    #    (VPU outer-product path, lane-dense 128-wide loads / 256-wide stores).
    B, n, T = 8, 16, 8
    f = jax.random.normal(k1, (B, n, T), dtype=jnp.float32)
    out = jax.block_until_ready(cov_pool(f, reg_mode="mle"))
    assert out.shape == (B, 1, n, n), out.shape
    assert jnp.allclose(out, _ref(f), atol=1e-5, rtol=1e-5), "mismatch (small, VPU path)"

    # 2) Multi-step grid (forced small block) -- exercises ragged / step-count selection.
    B2 = 96
    f2 = jax.random.normal(k2, (B2, n, T), dtype=jnp.float32)
    out2 = jax.block_until_ready(cov_pool(f2, block_g=32))
    assert out2.shape == (B2, 1, n, n), out2.shape
    assert jnp.allclose(out2, _ref(f2), atol=1e-5, rtol=1e-5), "mismatch (multi-step)"

    # 3) bf16 input -> float32 covariance (accumulation and 1/(T-1) scaling stay in f32).
    f3 = f.astype(jnp.bfloat16)
    out3 = jax.block_until_ready(cov_pool(f3))
    ref3 = _ref(f3.astype(jnp.float32))
    assert out3.dtype == jnp.float32
    assert jnp.allclose(out3, ref3, atol=1e-4, rtol=1e-4), "mismatch (bf16 input)"

    # 4) Longer T takes the MXU einsum path (contraction dim large enough for the MXU).
    B4, n4, T4 = 8, 8, 40
    f4 = jax.random.normal(k3, (B4, n4, T4), dtype=jnp.float32)
    out4 = jax.block_until_ready(cov_pool(f4))
    assert out4.shape == (B4, 1, n4, n4), out4.shape
    assert jnp.allclose(out4, _ref(f4), atol=1e-4, rtol=1e-4), "mismatch (MXU path)"

    print("KERNEL_OK")
</pallas_src>

<mosaic_0001>
module attributes {stable_mosaic.version = 11 : i64} {
  func.func @_cov_pool_kernel(%arg0: i32, %arg1: memref<8x128xf32, #tpu.memory_space<vmem>>, %arg2: memref<8x256xf32, #tpu.memory_space<vmem>>) attributes {dimension_semantics = [#tpu.dimension_semantics<parallel>], iteration_bounds = array<i64: 1>, scalar_prefetch = 0 : i64, scratch_operands = 0 : i64, tpu.core_type = #tpu.core_type<tc>, window_params = [{transform_indices = @transform_0, window_bounds = array<i64: 8, 128>}, {transform_indices = @transform_1, window_bounds = array<i64: 8, 256>}]} {
    %c0 = arith.constant 0 : index
    %c0_0 = arith.constant 0 : index
    %0 = vector.load %arg1[%c0, %c0_0] : memref<8x128xf32, #tpu.memory_space<vmem>>, vector<8x128xf32>
    %1 = vector.shape_cast %0 : vector<8x128xf32> to vector<8x16x8xf32>
    %2 = vector.extract_strided_slice %1 {offsets = [0, 0, 0], sizes = [8, 16, 1], strides = [1, 1, 1]} : vector<8x16x8xf32> to vector<8x16x1xf32>
    %3 = vector.extract_strided_slice %1 {offsets = [0, 0, 0], sizes = [8, 16, 1], strides = [1, 1, 1]} : vector<8x16x8xf32> to vector<8x16x1xf32>
    %4 = vector.shape_cast %3 : vector<8x16x1xf32> to vector<8x16xf32>
    %5 = vector.shape_cast %4 : vector<8x16xf32> to vector<8x1x16xf32>
    %6 = vector.broadcast %2 : vector<8x16x1xf32> to vector<8x16x16xf32>
    %7 = vector.broadcast %5 : vector<8x1x16xf32> to vector<8x16x16xf32>
    %8 = arith.mulf %6, %7 : vector<8x16x16xf32>
    %9 = vector.extract_strided_slice %1 {offsets = [0, 0, 1], sizes = [8, 16, 1], strides = [1, 1, 1]} : vector<8x16x8xf32> to vector<8x16x1xf32>
    %10 = vector.extract_strided_slice %1 {offsets = [0, 0, 1], sizes = [8, 16, 1], strides = [1, 1, 1]} : vector<8x16x8xf32> to vector<8x16x1xf32>
    %11 = vector.shape_cast %10 : vector<8x16x1xf32> to vector<8x16xf32>
    %12 = vector.shape_cast %11 : vector<8x16xf32> to vector<8x1x16xf32>
    %13 = vector.broadcast %9 : vector<8x16x1xf32> to vector<8x16x16xf32>
    %14 = vector.broadcast %12 : vector<8x1x16xf32> to vector<8x16x16xf32>
    %15 = arith.mulf %13, %14 : vector<8x16x16xf32>
    %16 = arith.addf %8, %15 : vector<8x16x16xf32>
    %17 = vector.extract_strided_slice %1 {offsets = [0, 0, 2], sizes = [8, 16, 1], strides = [1, 1, 1]} : vector<8x16x8xf32> to vector<8x16x1xf32>
    %18 = vector.extract_strided_slice %1 {offsets = [0, 0, 2], sizes = [8, 16, 1], strides = [1, 1, 1]} : vector<8x16x8xf32> to vector<8x16x1xf32>
    %19 = vector.shape_cast %18 : vector<8x16x1xf32> to vector<8x16xf32>
    %20 = vector.shape_cast %19 : vector<8x16xf32> to vector<8x1x16xf32>
    %21 = vector.broadcast %17 : vector<8x16x1xf32> to vector<8x16x16xf32>
    %22 = vector.broadcast %20 : vector<8x1x16xf32> to vector<8x16x16xf32>
    %23 = arith.mulf %21, %22 : vector<8x16x16xf32>
    %24 = arith.addf %16, %23 : vector<8x16x16xf32>
    %25 = vector.extract_strided_slice %1 {offsets = [0, 0, 3], sizes = [8, 16, 1], strides = [1, 1, 1]} : vector<8x16x8xf32> to vector<8x16x1xf32>
    %26 = vector.extract_strided_slice %1 {offsets = [0, 0, 3], sizes = [8, 16, 1], strides = [1, 1, 1]} : vector<8x16x8xf32> to vector<8x16x1xf32>
    %27 = vector.shape_cast %26 : vector<8x16x1xf32> to vector<8x16xf32>
    %28 = vector.shape_cast %27 : vector<8x16xf32> to vector<8x1x16xf32>
    %29 = vector.broadcast %25 : vector<8x16x1xf32> to vector<8x16x16xf32>
    %30 = vector.broadcast %28 : vector<8x1x16xf32> to vector<8x16x16xf32>
    %31 = arith.mulf %29, %30 : vector<8x16x16xf32>
    %32 = arith.addf %24, %31 : vector<8x16x16xf32>
    %33 = vector.extract_strided_slice %1 {offsets = [0, 0, 4], sizes = [8, 16, 1], strides = [1, 1, 1]} : vector<8x16x8xf32> to vector<8x16x1xf32>
    %34 = vector.extract_strided_slice %1 {offsets = [0, 0, 4], sizes = [8, 16, 1], strides = [1, 1, 1]} : vector<8x16x8xf32> to vector<8x16x1xf32>
    %35 = vector.shape_cast %34 : vector<8x16x1xf32> to vector<8x16xf32>
    %36 = vector.shape_cast %35 : vector<8x16xf32> to vector<8x1x16xf32>
    %37 = vector.broadcast %33 : vector<8x16x1xf32> to vector<8x16x16xf32>
    %38 = vector.broadcast %36 : vector<8x1x16xf32> to vector<8x16x16xf32>
    %39 = arith.mulf %37, %38 : vector<8x16x16xf32>
    %40 = arith.addf %32, %39 : vector<8x16x16xf32>
    %41 = vector.extract_strided_slice %1 {offsets = [0, 0, 5], sizes = [8, 16, 1], strides = [1, 1, 1]} : vector<8x16x8xf32> to vector<8x16x1xf32>
    %42 = vector.extract_strided_slice %1 {offsets = [0, 0, 5], sizes = [8, 16, 1], strides = [1, 1, 1]} : vector<8x16x8xf32> to vector<8x16x1xf32>
    %43 = vector.shape_cast %42 : vector<8x16x1xf32> to vector<8x16xf32>
    %44 = vector.shape_cast %43 : vector<8x16xf32> to vector<8x1x16xf32>
    %45 = vector.broadcast %41 : vector<8x16x1xf32> to vector<8x16x16xf32>
    %46 = vector.broadcast %44 : vector<8x1x16xf32> to vector<8x16x16xf32>
    %47 = arith.mulf %45, %46 : vector<8x16x16xf32>
    %48 = arith.addf %40, %47 : vector<8x16x16xf32>
    %49 = vector.extract_strided_slice %1 {offsets = [0, 0, 6], sizes = [8, 16, 1], strides = [1, 1, 1]} : vector<8x16x8xf32> to vector<8x16x1xf32>
    %50 = vector.extract_strided_slice %1 {offsets = [0, 0, 6], sizes = [8, 16, 1], strides = [1, 1, 1]} : vector<8x16x8xf32> to vector<8x16x1xf32>
    %51 = vector.shape_cast %50 : vector<8x16x1xf32> to vector<8x16xf32>
    %52 = vector.shape_cast %51 : vector<8x16xf32> to vector<8x1x16xf32>
    %53 = vector.broadcast %49 : vector<8x16x1xf32> to vector<8x16x16xf32>
    %54 = vector.broadcast %52 : vector<8x1x16xf32> to vector<8x16x16xf32>
    %55 = arith.mulf %53, %54 : vector<8x16x16xf32>
    %56 = arith.addf %48, %55 : vector<8x16x16xf32>
    %57 = vector.extract_strided_slice %1 {offsets = [0, 0, 7], sizes = [8, 16, 1], strides = [1, 1, 1]} : vector<8x16x8xf32> to vector<8x16x1xf32>
    %58 = vector.extract_strided_slice %1 {offsets = [0, 0, 7], sizes = [8, 16, 1], strides = [1, 1, 1]} : vector<8x16x8xf32> to vector<8x16x1xf32>
    %59 = vector.shape_cast %58 : vector<8x16x1xf32> to vector<8x16xf32>
    %60 = vector.shape_cast %59 : vector<8x16xf32> to vector<8x1x16xf32>
    %61 = vector.broadcast %57 : vector<8x16x1xf32> to vector<8x16x16xf32>
    %62 = vector.broadcast %60 : vector<8x1x16xf32> to vector<8x16x16xf32>
    %63 = arith.mulf %61, %62 : vector<8x16x16xf32>
    %64 = arith.addf %56, %63 : vector<8x16x16xf32>
    %cst = arith.constant 0.142857149 : f32
    %65 = vector.broadcast %cst : f32 to vector<8x16x16xf32>
    %66 = arith.mulf %64, %65 : vector<8x16x16xf32>
    %67 = vector.shape_cast %66 : vector<8x16x16xf32> to vector<8x256xf32>
    %c0_1 = arith.constant 0 : index
    %c0_2 = arith.constant 0 : index
    %68 = vector.load %arg2[%c0_1, %c0_2] : memref<8x256xf32, #tpu.memory_space<vmem>>, vector<8x256xf32>
    tpu.vector_store %arg2[%c0_1, %c0_2], %67 {strides = array<i32>} : memref<8x256xf32, #tpu.memory_space<vmem>>, vector<8x256xf32>,
    return
  }
  func.func @transform_0(%arg0: i32) -> (i32, i32) {
    %c0_i32 = arith.constant 0 : i32
    %c0_i32_0 = arith.constant 0 : i32
    return %arg0, %c0_i32 : i32, i32
  }
  func.func @transform_1(%arg0: i32) -> (i32, i32) {
    %c0_i32 = arith.constant 0 : i32
    %c0_i32_0 = arith.constant 0 : i32
    return %arg0, %c0_i32 : i32, i32
  }
}

</mosaic_0001>

<bundles_post_ra>
// kernel: tpu_custom_call.1
= control target key start
LH: loop header
LB: loop body
LE: loop exit
PB: predicated region body
PF: predicated region fallthrough
CT: control target
= control target key end

     0   :  { %6 = vsyncpa [#allocation3], 0  ;;  %s3546_s0 = inlined_call_operand.hbm [shape: f32[8,128], index: 0, kind: input, shape index: {}]   ;;  %s3547_s1 = inlined_call_operand.hbm [shape: f32[8,256], index: 1, kind: output, shape index: {}]  }
   0x1   :  { %7 = vsyncpa [#allocation4], 0  ;;  %s2615_s6 = smov [#allocation2]   ;;  %s2567_s10 = scalar_lea.hbm %s3546_s0, 128 }
   0x2   :  { %s14_s7 = sshll.u32 %s2615_s6, 4  ;;  %p2568_p0 = scmp.ne.s32.totalorder %s3546_s0, %s2567_s10  ;;  %s15_s7 = int_to_ptr.vmem [resolvable:$true] %s14_s7 }
   0x3   :  { %p2571_p1 = scmp.lt.u32.totalorder %s2567_s10, %s3546_s0 }
   0x5   :  { %p2573_p2 = pnand %p2571_p1, %p2568_p0 }
   0x7   :  { %2576 = shalt.err (!%p2573_p2)
}
   0x8   :  { %s2577_s15 = scalar_lea.vmem %s15_s7, 128  ;;  %p2582_p4 = scmp.lt.s32.totalorder %s15_s7, %s15_s7 }
   0x9   :  { %p2578_p3 = scmp.ne.s32.totalorder %s15_s7, %s2577_s15  ;;  %p2583_p5 = scmp.lt.s32.totalorder %s2577_s15, %s2577_s15 }
   0xb   :  { %p2584_p6 = por %p2583_p5, %p2582_p4 }
   0xd   :  { %p2585_p7 = pnand %p2584_p6, %p2578_p3 }
   0xf   :  { %2588 = shalt.err (!%p2585_p7)
}
  0x10   :  { %17 = dma.hbm_to_vmem [thread:$0]  %s3546_s0, 128, %s15_s7, [#allocation3]  }
  0x11   :  { %2611 = dma.done.wait [#allocation3], 128  }
  0x12   :  { %2612 = vsyncadd [#allocation3], 4294967168  ;;  %v2664_v0 = vld [vmem:[#allocation2] sm:$0xff]  ;;  %s2616_s18 = smov 104   ;;  %s2617_s19 = smov 120   ;;  %v2622_v1 = vmov 0   ;;  %v73_v2 = vlaneseq }
  0x13   :  { %29 = vrot.lane.b32.xlu1 %v2664_v0, %s2616_s18  ;;  %23 = vrot.lane.b32.xlu0 %v2664_v0, %s2617_s19  ;;  %s2618_s20 = smov 96   ;;  %s2619_s21 = smov 112   ;;  %v2632_v10 = vmov 1983009808   ;;  %v2633_v15 = vmov 1934713408  }
  0x14   :  { %s2620_s22 = smov 80   ;;  %s2621_s0 = smov 88   ;;  %2551 = vset.pattern.permute.xlu1 %v2622_v1  ;;  %2552 = vset.pattern.permute.xlu0 %v2622_v1  ;;  %v74_v3 = vshrl.u32 %v73_v2, 7  ;;  %v421_v4 = vand.u32 127, %v73_v2  ;;  %v71_v11 = vunpack.c.l.s4 %v2632_v10  ;;  %v135_v16 = vunpack.c.l.s4 %v2633_v15 }
  0x15   :  { %s2623_s23 = smov 64   ;;  %s2624_s24 = smov 72   ;;  %vm431_vm0 = vcmask 130112   ;;  %vm2486_vm1 = vcmask 130048   ;;  %vm2488_vm2 = vcmask 261120   ;;  %vm2490_vm3 = vcmask 392192  }
  0x16   :  { %s2625_s25 = smov 48   ;;  %s2626_s26 = smov 56   ;;  %v2681_v5 = vsub.s32 %v421_v4, %v74_v3  ;;  %v426_v6 = vadd.s32 4294967288, %v421_v4  ;;  %v72_v14 = vunpack.c.0.s8 %v71_v11  ;;  %v136_v22 = vunpack.c.0.s8 %v135_v16 }
  0x17   :  { %32 = vrot.lane.b32.xlu1 %v2664_v0, %s2618_s20  ;;  %26 = vrot.lane.b32.xlu0 %v2664_v0, %s2619_s21  ;;  %s2627_s27 = smov 32   ;;  %s2628_s28 = smov 40   ;;  %vm2492_vm4 = vcmask 523264   ;;  %vm2494_vm5 = vcmask 654336   ;;  %vm2496_vm6 = vcmask 785408   ;;  %vm2498_vm7 = vcmask 916480  }
  0x18   :  { %v2683_v7 = vsub.s32 %v426_v6, %v74_v3  ;;  %s2629_s29 = smov 16   ;;  %s2630_s30 = smov 24   ;;  %v2702_v20 = vsub.s32 %v72_v14, %v74_v3  ;;  %v2711_v29 = vsub.s32 %v136_v22, %v74_v3 }
  0x19   :  { %s2631_s2 = smov 8   ;;  %s2641_s3 = smov [#allocation5]  }
  0x1a   :  { %s2515_s4 = sshll.u32 %s2641_s3, 4  ;;  %s2516_s4 = int_to_ptr.vmem [resolvable:$true] %s2515_s4 }
  0x1b   :  { %38 = vrot.lane.b32.xlu1 %v2664_v0, %s2620_s22  ;;  %35 = vrot.lane.b32.xlu0 %v2664_v0, %s2621_s0  ;;  %s2589_s5 = scalar_lea.vmem %s2516_s4, 256  ;;  %p2594_p9 = scmp.lt.s32.totalorder %s2516_s4, %s2516_s4 }
  0x1c   :  { %p2590_p8 = scmp.ne.s32.totalorder %s2516_s4, %s2589_s5  ;;  %p2595_p10 = scmp.lt.s32.totalorder %s2589_s5, %s2589_s5 }
  0x1e   :  { %p2596_p11 = por %p2595_p10, %p2594_p9 }
  0x1f   :  { %44 = vrot.lane.b32.xlu1 %v2664_v0, %s2623_s23  ;;  %41 = vrot.lane.b32.xlu0 %v2664_v0, %s2624_s24 }
  0x20   :  { %p2597_p12 = pnand %p2596_p11, %p2590_p8 }
  0x23   :  { %50 = vrot.lane.b32.xlu1 %v2664_v0, %s2625_s25  ;;  %47 = vrot.lane.b32.xlu0 %v2664_v0, %s2626_s26 }
  0x27   :  { %56 = vrot.lane.b32.xlu1 %v2664_v0, %s2627_s27  ;;  %53 = vrot.lane.b32.xlu0 %v2664_v0, %s2628_s28 }
  0x2b   :  { %62 = vrot.lane.b32.xlu1 %v2664_v0, %s2629_s29  ;;  %59 = vrot.lane.b32.xlu0 %v2664_v0, %s2630_s30 }
  0x2f   :  { %65 = vrot.lane.b32.xlu0 %v2664_v0, %s2631_s2 }
  0x85   :  { %v2692_v8 = vpop.permute.xlu1 %29  ;;  %v2694_v9 = vpop.permute.xlu0 %23 }
  0x86   :  { %v84_v21 = vcombine.low %v2694_v9, %v2692_v8  ;;  %v85_v4 = vcombine.high %v2694_v9, %v2692_v8 }
  0x88   :  { %v92_v27 = vrot.slane %v84_v21, %v2702_v20 }
  0x89   :  { %v2696_v12 = vpop.permute.xlu1 %32  ;;  %v2698_v13 = vpop.permute.xlu0 %26 }
  0x8a   :  { %v68_v17 = vcombine.low %v2664_v0, %v2698_v13  ;;  %v69_v59 = vcombine.high %v2664_v0, %v2698_v13 }
  0x8c   :  { %v76_v23 = vrot.slane %v68_v17, %v2702_v20  ;;  %v83_v15 = vrot.slane %v69_v59, %v2702_v20 }
  0x8d   :  { %v39_v18 = vpop.permute.xlu1 %38  ;;  %v36_v19 = vpop.permute.xlu0 %35 }
  0x8e   :  { %v100_v24 = vcombine.low %v2696_v12, %v39_v18  ;;  %v132_v30 = vcombine.low %v76_v23, %v92_v27  ;;  %v133_v60 = vcombine.high %v76_v23, %v92_v27  ;;  %v101_v61 = vcombine.high %v2696_v12, %v39_v18 }
  0x90   :  { %v108_v31 = vrot.slane %v100_v24, %v2702_v20  ;;  %v140_v36 = vrot.slane %v132_v30, %v2711_v29  ;;  %v147_v16 = vrot.slane %v133_v60, %v2711_v29  ;;  %v115_v8 = vrot.slane %v101_v61, %v2702_v20 }
  0x91   :  { %v2708_v25 = vpop.permute.xlu1 %44  ;;  %v42_v26 = vpop.permute.xlu0 %41 }
  0x92   :  { %v116_v28 = vcombine.low %v36_v19, %v42_v26  ;;  %v117_v54 = vcombine.high %v36_v19, %v42_v26  ;;  %v99_v19 = vrot.slane %v85_v4, %v2702_v20 }
  0x94   :  { %v124_v32 = vrot.slane %v116_v28, %v2702_v20  ;;  %v131_v6 = vrot.slane %v117_v54, %v2702_v20  ;;  %v148_v26 = vcombine.low %v83_v15, %v99_v19  ;;  %v2635_v54 = vmov 2  }
  0x95   :  { %v51_v33 = vpop.permute.xlu1 %50  ;;  %v48_v34 = vpop.permute.xlu0 %47 }
  0x96   :  { %v164_v35 = vcombine.low %v108_v31, %v124_v32  ;;  %v204_v45 = vcombine.low %v2708_v25, %v51_v33  ;;  %v165_v55 = vcombine.high %v108_v31, %v124_v32  ;;  %v205_v11 = vcombine.high %v2708_v25, %v51_v33 }
  0x97   :  { %v180_v21 = vcombine.low %v115_v8, %v131_v6  ;;  %v156_v33 = vrot.slane %v148_v26, %v2711_v29 }
  0x98   :  { %v172_v37 = vrot.slane %v164_v35, %v2711_v29  ;;  %v212_v49 = vrot.slane %v204_v45, %v2702_v20  ;;  %v179_v10 = vrot.slane %v165_v55, %v2711_v29  ;;  %v219_v23 = vrot.slane %v205_v11, %v2702_v20 }
  0x99   :  { %v57_v38 = vpop.permute.xlu1 %56  ;;  %v54_v39 = vpop.permute.xlu0 %53  ;;  %v188_v28 = vrot.slane %v180_v21, %v2711_v29  ;;  %v181_v35 = vcombine.high %v115_v8, %v131_v6  ;;  %v2636_v55 = vmov 3  }
  0x9a   :  { %v2717_v40 = vcombine.low %v140_v36, %v172_v37  ;;  %v220_v41 = vcombine.low %v48_v34, %v54_v39  ;;  %v2720_v43 = vcombine.high %v140_v36, %v172_v37  ;;  %v221_v62 = vcombine.high %v48_v34, %v54_v39 }
  0x9b   :  { %v2753_v22 = vcombine.low %v147_v16, %v179_v10  ;;  %v2761_v30 = vcombine.high %v147_v16, %v179_v10  ;;  %v2770_v36 = vcombine.low %v156_v33, %v188_v28  ;;  %v149_v39 = vcombine.high %v83_v15, %v99_v19 }
  0x9c   :  { %342 = vperm.xlu1 %2551, %v2717_v40   ;;  %v228_v46 = vrot.slane %v220_v41, %v2702_v20  ;;  %v235_v9 = vrot.slane %v221_v62, %v2702_v20 }
  0x9d   :  { %v60_v42 = vpop.permute.xlu0 %59  ;;  %v63_v44 = vpop.permute.xlu1 %62 }
  0x9e   :  { %v236_v47 = vcombine.low %v57_v38, %v63_v44  ;;  %v268_v51 = vcombine.low %v212_v49, %v228_v46  ;;  %v269_v63 = vcombine.high %v212_v49, %v228_v46  ;;  %v237_v2 = vcombine.high %v57_v38, %v63_v44 }
  0x9f   :  { %v284_v27 = vcombine.low %v219_v23, %v235_v9  ;;  %v285_v41 = vcombine.high %v219_v23, %v235_v9  ;;  %v2777_v44 = vcombine.high %v156_v33, %v188_v28 }
  0xa0   :  { %352 = vperm.xlu1 %2551, %v2720_v43   ;;  %v244_v52 = vrot.slane %v236_v47, %v2702_v20  ;;  %v276_v1 = vrot.slane %v268_v51, %v2711_v29  ;;  %v283_v17 = vrot.slane %v269_v63, %v2711_v29  ;;  %v251_v18 = vrot.slane %v237_v2, %v2702_v20 }
  0xa1   :  { %v66_v48 = vpop.permute.xlu0 %65  ;;  %v292_v34 = vrot.slane %v284_v27, %v2711_v29  ;;  %v163_v47 = vrot.slane %v149_v39, %v2711_v29 }
  0xa2   :  { %v252_v50 = vcombine.low %v60_v42, %v66_v48  ;;  %v253_v56 = vcombine.high %v60_v42, %v66_v48  ;;  %v195_v42 = vrot.slane %v181_v35, %v2711_v29  ;;  %v299_v48 = vrot.slane %v285_v41, %v2711_v29 }
  0xa4   :  { %v260_v53 = vrot.slane %v252_v50, %v2702_v20  ;;  %v267_v0 = vrot.slane %v253_v56, %v2702_v20  ;;  %v2786_v49 = vcombine.low %v163_v47, %v195_v42  ;;  %v2792_v51 = vcombine.high %v163_v47, %v195_v42 }
  0xa6   :  { %v300_v57 = vcombine.low %v244_v52, %v260_v53  ;;  %v301_v58 = vcombine.high %v244_v52, %v260_v53  ;;  %v316_v24 = vcombine.low %v251_v18, %v267_v0  ;;  %v317_v37 = vcombine.high %v251_v18, %v267_v0 }
  0xa7   :  { %v2634_v53 = vmov 1  }
  0xa8   :  { %v308_v3 = vrot.slane %v300_v57, %v2711_v29  ;;  %v315_v12 = vrot.slane %v301_v58, %v2711_v29  ;;  %v324_v31 = vrot.slane %v316_v24, %v2711_v29  ;;  %v331_v45 = vrot.slane %v317_v37, %v2711_v29 }
  0xa9   :  { %v2637_v58 = vmov 4  }
  0xaa   :  { %v2740_v13 = vcombine.low %v276_v1, %v308_v3  ;;  %v2742_v14 = vcombine.high %v276_v1, %v308_v3  ;;  %v2756_v25 = vcombine.low %v283_v17, %v315_v12  ;;  %v2764_v32 = vcombine.high %v283_v17, %v315_v12 }
  0xab   :  { %v2772_v38 = vcombine.low %v292_v34, %v324_v31  ;;  %v2780_v46 = vcombine.high %v292_v34, %v324_v31  ;;  %v2788_v50 = vcombine.low %v299_v48, %v331_v45  ;;  %v2794_v52 = vcombine.high %v299_v48, %v331_v45 }
  0xac   :  { %357 = vperm.xlu1 %2551, %v2742_v14   ;;  %347 = vperm.xlu0 %2552, %v2740_v13   ;;  %v2638_v48 = vmov 5  }
  0xb0   :  { %367 = vperm.xlu1 %2551, %v2756_v25   ;;  %362 = vperm.xlu0 %2552, %v2753_v22  }
  0xb4   :  { %377 = vperm.xlu1 %2551, %v2764_v32   ;;  %372 = vperm.xlu0 %2552, %v2761_v30  }
  0xb8   :  { %387 = vperm.xlu1 %2551, %v2772_v38   ;;  %382 = vperm.xlu0 %2552, %v2770_v36  }
  0xbc   :  { %397 = vperm.xlu1 %2551, %v2780_v46   ;;  %392 = vperm.xlu0 %2552, %v2777_v44  }
  0xc0   :  { %407 = vperm.xlu1 %2551, %v2788_v50   ;;  %402 = vperm.xlu0 %2552, %v2786_v49  }
  0xc4   :  { %417 = vperm.xlu1 %2551, %v2794_v52   ;;  %412 = vperm.xlu0 %2552, %v2792_v51  }
  0xc8   :  { %2554 = vset.pattern.permute.xlu1 %v2634_v53  ;;  %2553 = vset.pattern.permute.xlu0 %v2634_v53 }
  0xc9   :  { %579 = vperm.xlu1 %2554, %v2740_v13   ;;  %575 = vperm.xlu0 %2553, %v2717_v40  }
  0xcd   :  { %583 = vperm.xlu1 %2554, %v2720_v43   ;;  %587 = vperm.xlu0 %2553, %v2742_v14  }
  0xd1   :  { %591 = vperm.xlu1 %2554, %v2753_v22   ;;  %595 = vperm.xlu0 %2553, %v2756_v25  }
  0xd5   :  { %599 = vperm.xlu1 %2554, %v2761_v30   ;;  %603 = vperm.xlu0 %2553, %v2764_v32  }
  0xd9   :  { %607 = vperm.xlu1 %2554, %v2770_v36   ;;  %611 = vperm.xlu0 %2553, %v2772_v38  }
  0xdd   :  { %615 = vperm.xlu1 %2554, %v2777_v44   ;;  %619 = vperm.xlu0 %2553, %v2780_v46  }
  0xe1   :  { %623 = vperm.xlu1 %2554, %v2786_v49   ;;  %627 = vperm.xlu0 %2553, %v2788_v50  }
  0xe5   :  { %631 = vperm.xlu1 %2554, %v2792_v51   ;;  %635 = vperm.xlu0 %2553, %v2794_v52  }
  0xe9   :  { %2555 = vset.pattern.permute.xlu1 %v2635_v54  ;;  %2556 = vset.pattern.permute.xlu0 %v2635_v54 }
  0xea   :  { %799 = vperm.xlu1 %2555, %v2717_v40   ;;  %803 = vperm.xlu0 %2556, %v2740_v13  }
  0xee   :  { %807 = vperm.xlu1 %2555, %v2720_v43   ;;  %815 = vperm.xlu0 %2556, %v2753_v22  }
  0xf2   :  { %811 = vperm.xlu1 %2555, %v2742_v14   ;;  %823 = vperm.xlu0 %2556, %v2761_v30  }
  0xf6   :  { %819 = vperm.xlu1 %2555, %v2756_v25   ;;  %831 = vperm.xlu0 %2556, %v2770_v36  }
  0xfa   :  { %827 = vperm.xlu1 %2555, %v2764_v32   ;;  %839 = vperm.xlu0 %2556, %v2777_v44  }
  0xfe   :  { %835 = vperm.xlu1 %2555, %v2772_v38   ;;  %847 = vperm.xlu0 %2556, %v2786_v49  }
 0x102   :  { %843 = vperm.xlu1 %2555, %v2780_v46   ;;  %855 = vperm.xlu0 %2556, %v2792_v51  }
 0x106   :  { %851 = vperm.xlu1 %2555, %v2788_v50   ;;  %2557 = vset.pattern.permute.xlu0 %v2636_v55 }
 0x107   :  { %1023 = vperm.xlu0 %2557, %v2717_v40  }
 0x10a   :  { %859 = vperm.xlu1 %2555, %v2794_v52  }
 0x10b   :  { %1035 = vperm.xlu0 %2557, %v2742_v14  }
 0x10e   :  { %2558 = vset.pattern.permute.xlu1 %v2636_v55 }
 0x10f   :  { %1027 = vperm.xlu1 %2558, %v2740_v13   ;;  %1043 = vperm.xlu0 %2557, %v2756_v25  }
 0x113   :  { %1031 = vperm.xlu1 %2558, %v2720_v43   ;;  %1051 = vperm.xlu0 %2557, %v2764_v32  }
 0x117   :  { %1039 = vperm.xlu1 %2558, %v2753_v22   ;;  %1059 = vperm.xlu0 %2557, %v2772_v38  }
 0x11b   :  { %1047 = vperm.xlu1 %2558, %v2761_v30   ;;  %1067 = vperm.xlu0 %2557, %v2780_v46   ;;  %v2842_v56 = vpop.permute.xlu1 %342 }
 0x11c   :  { %v425_v61 = vrot.slane %v2842_v56, %v2681_v5 }
 0x11f   :  { %1055 = vperm.xlu1 %2558, %v2770_v36   ;;  %1075 = vperm.xlu0 %2557, %v2788_v50   ;;  %v2846_v57 = vpop.permute.xlu1 %352 }
 0x120   :  { %v436_v62 = vrot.slane %v2846_v57, %v2681_v5 }
 0x123   :  { %1063 = vperm.xlu1 %2558, %v2777_v44   ;;  %1083 = vperm.xlu0 %2557, %v2794_v52  }
 0x127   :  { %1071 = vperm.xlu1 %2558, %v2786_v49   ;;  %2560 = vset.pattern.permute.xlu0 %v2637_v58 }
 0x128   :  { %1251 = vperm.xlu0 %2560, %v2740_v13  }
 0x12b   :  { %v2850_v59 = vpop.permute.xlu1 %357  ;;  %1079 = vperm.xlu1 %2558, %v2792_v51   ;;  %v348_v60 = vpop.permute.xlu0 %347 }
 0x12c   :  { %v440_v63 = vrot.slane %v2850_v59, %v2683_v7  ;;  %v430_v1 = vrot.slane %v348_v60, %v2683_v7  ;;  %1263 = vperm.xlu0 %2560, %v2753_v22  }
 0x12e   :  { %v2862_v2 = vsel %vm431_vm0, %v440_v63, %v436_v62  ;;  %v432_v3 = vsel %vm431_vm0, %v430_v1, %v425_v61 }
 0x12f   :  { %v2865_v4 = vpop.permute.xlu1 %367  ;;  %2559 = vset.pattern.permute.xlu1 %v2637_v58  ;;  %v2867_v6 = vpop.permute.xlu0 %362  ;;  %v558_v63 = vmul.f32 %v432_v3, %v2842_v56  ;;  %v559_v1 = vmul.f32 %v432_v3, %v348_v60  ;;  %v560_v56 = vmul.f32 %v2862_v2, %v2846_v57  ;;  %v561_v60 = vmul.f32 %v2862_v2, %v2850_v59 }
 0x130   :  { %v449_v10 = vrot.slane %v2865_v4, %v2683_v7  ;;  %v445_v11 = vrot.slane %v2867_v6, %v2681_v5  ;;  %1247 = vperm.xlu1 %2559, %v2717_v40   ;;  %1271 = vperm.xlu0 %2560, %v2761_v30  }
 0x132   :  { %v2876_v0 = vsel %vm431_vm0, %v449_v10, %v445_v11 }
 0x133   :  { %v2878_v12 = vpop.permute.xlu1 %377  ;;  %v2880_v15 = vpop.permute.xlu0 %372  ;;  %v562_v59 = vmul.f32 %v2876_v0, %v2867_v6  ;;  %v563_v2 = vmul.f32 %v2876_v0, %v2865_v4 }
 0x134   :  { %v458_v16 = vrot.slane %v2878_v12, %v2683_v7  ;;  %v454_v8 = vrot.slane %v2880_v15, %v2681_v5  ;;  %1255 = vperm.xlu1 %2559, %v2720_v43   ;;  %1279 = vperm.xlu0 %2560, %v2770_v36  }
 0x136   :  { %v2889_v9 = vsel %vm431_vm0, %v458_v16, %v454_v8 }
 0x137   :  { %v2891_v17 = vpop.permute.xlu1 %387  ;;  %v2893_v18 = vpop.permute.xlu0 %382  ;;  %v564_v4 = vmul.f32 %v2889_v9, %v2880_v15  ;;  %v565_v0 = vmul.f32 %v2889_v9, %v2878_v12 }
 0x138   :  { %v467_v19 = vrot.slane %v2891_v17, %v2683_v7  ;;  %v463_v21 = vrot.slane %v2893_v18, %v2681_v5  ;;  %1259 = vperm.xlu1 %2559, %v2742_v14   ;;  %1287 = vperm.xlu0 %2560, %v2777_v44  }
 0x13a   :  { %v2902_v23 = vsel %vm431_vm0, %v467_v19, %v463_v21 }
 0x13b   :  { %v2904_v24 = vpop.permute.xlu1 %397  ;;  %v2906_v26 = vpop.permute.xlu0 %392  ;;  %v566_v12 = vmul.f32 %v2902_v23, %v2893_v18  ;;  %v567_v9 = vmul.f32 %v2902_v23, %v2891_v17 }
 0x13c   :  { %v476_v27 = vrot.slane %v2904_v24, %v2683_v7  ;;  %v472_v28 = vrot.slane %v2906_v26, %v2681_v5  ;;  %1267 = vperm.xlu1 %2559, %v2756_v25   ;;  %1295 = vperm.xlu0 %2560, %v2786_v49  }
 0x13e   :  { %v2915_v31 = vsel %vm431_vm0, %v476_v27, %v472_v28 }
 0x13f   :  { %v2917_v33 = vpop.permute.xlu1 %407  ;;  %v2919_v34 = vpop.permute.xlu0 %402  ;;  %v568_v17 = vmul.f32 %v2915_v31, %v2906_v26  ;;  %v569_v23 = vmul.f32 %v2915_v31, %v2904_v24 }
 0x140   :  { %v485_v35 = vrot.slane %v2917_v33, %v2683_v7  ;;  %v481_v37 = vrot.slane %v2919_v34, %v2681_v5  ;;  %1275 = vperm.xlu1 %2559, %v2764_v32   ;;  %1303 = vperm.xlu0 %2560, %v2792_v51  }
 0x142   :  { %v2928_v39 = vsel %vm431_vm0, %v485_v35, %v481_v37 }
 0x143   :  { %v2930_v41 = vpop.permute.xlu1 %417  ;;  %v2932_v42 = vpop.permute.xlu0 %412  ;;  %v570_v24 = vmul.f32 %v2928_v39, %v2919_v34  ;;  %v571_v31 = vmul.f32 %v2928_v39, %v2917_v33 }
 0x144   :  { %v494_v45 = vrot.slane %v2930_v41, %v2683_v7  ;;  %v490_v47 = vrot.slane %v2932_v42, %v2681_v5  ;;  %1283 = vperm.xlu1 %2559, %v2772_v38   ;;  %2561 = vset.pattern.permute.xlu0 %v2638_v48 }
 0x145   :  { %1471 = vperm.xlu0 %2561, %v2717_v40  }
 0x146   :  { %v2941_v53 = vsel %vm431_vm0, %v494_v45, %v490_v47 }
 0x147   :  { %v572_v34 = vmul.f32 %v2941_v53, %v2932_v42  ;;  %v573_v39 = vmul.f32 %v2941_v53, %v2930_v41 }
 0x148   :  { %1291 = vperm.xlu1 %2559, %v2780_v46   ;;  %v580_v54 = vpop.permute.xlu1 %579  ;;  %v576_v55 = vpop.permute.xlu0 %575 }
 0x149   :  { %v645_v58 = vrot.slane %v580_v54, %v2683_v7  ;;  %v641_v61 = vrot.slane %v576_v55, %v2681_v5  ;;  %1483 = vperm.xlu0 %2561, %v2742_v14  }
 0x14b   :  { %v646_v62 = vsel %vm431_vm0, %v645_v58, %v641_v61 }
 0x14c   :  { %v766_v10 = vmul.f32 %v646_v62, %v576_v55  ;;  %v767_v11 = vmul.f32 %v646_v62, %v580_v54  ;;  %1299 = vperm.xlu1 %2559, %v2788_v50   ;;  %v584_v16 = vpop.permute.xlu1 %583  ;;  %v588_v8 = vpop.permute.xlu0 %587 }
 0x14d   :  { %v650_v19 = vrot.slane %v584_v16, %v2681_v5  ;;  %v654_v21 = vrot.slane %v588_v8, %v2683_v7  ;;  %1491 = vperm.xlu0 %2561, %v2756_v25  }
 0x14e   :  { %v2953_v27 = vadd.f32 %v766_v10, %v558_v63  ;;  %v2955_v28 = vadd.f32 %v767_v11, %v559_v1 }
 0x14f   :  { %v655_v35 = vsel %vm431_vm0, %v654_v21, %v650_v19 }
 0x150   :  { %v768_v3 = vmul.f32 %v655_v35, %v584_v16  ;;  %v769_v37 = vmul.f32 %v655_v35, %v588_v8  ;;  %1307 = vperm.xlu1 %2559, %v2794_v52   ;;  %v592_v45 = vpop.permute.xlu1 %591  ;;  %v596_v47 = vpop.permute.xlu0 %595 }
 0x151   :  { %v659_v54 = vrot.slane %v592_v45, %v2681_v5  ;;  %v663_v55 = vrot.slane %v596_v47, %v2683_v7  ;;  %1499 = vperm.xlu0 %2561, %v2764_v32  }
 0x152   :  { %v2966_v58 = vadd.f32 %v768_v3, %v560_v56  ;;  %v2968_v61 = vadd.f32 %v769_v37, %v561_v60 }
 0x153   :  { %v664_v57 = vsel %vm431_vm0, %v663_v55, %v659_v54 }
 0x154   :  { %v770_v62 = vmul.f32 %v664_v57, %v592_v45  ;;  %v771_v63 = vmul.f32 %v664_v57, %v596_v47  ;;  %2562 = vset.pattern.permute.xlu1 %v2638_v48  ;;  %v600_v1 = vpop.permute.xlu1 %599  ;;  %v604_v10 = vpop.permute.xlu0 %603 }
 0x155   :  { %v668_v11 = vrot.slane %v600_v1, %v2681_v5  ;;  %v672_v16 = vrot.slane %v604_v10, %v2683_v7  ;;  %1475 = vperm.xlu1 %2562, %v2740_v13   ;;  %1507 = vperm.xlu0 %2561, %v2772_v38  }
 0x156   :  { %v2979_v8 = vadd.f32 %v770_v62, %v562_v59  ;;  %v2981_v19 = vadd.f32 %v771_v63, %v563_v2 }
 0x157   :  { %v673_v6 = vsel %vm431_vm0, %v672_v16, %v668_v11 }
 0x158   :  { %v772_v48 = vmul.f32 %v673_v6, %v600_v1  ;;  %v773_v21 = vmul.f32 %v673_v6, %v604_v10  ;;  %v608_v35 = vpop.permute.xlu1 %607  ;;  %v612_v56 = vpop.permute.xlu0 %611 }
 0x159   :  { %v677_v60 = vrot.slane %v608_v35, %v2681_v5  ;;  %v681_v3 = vrot.slane %v612_v56, %v2683_v7  ;;  %1479 = vperm.xlu1 %2562, %v2720_v43   ;;  %1515 = vperm.xlu0 %2561, %v2780_v46  }
 0x15a   :  { %v2992_v37 = vadd.f32 %v772_v48, %v564_v4  ;;  %v2994_v45 = vadd.f32 %v773_v21, %v565_v0 }
 0x15b   :  { %v682_v15 = vsel %vm431_vm0, %v681_v3, %v677_v60 }
 0x15c   :  { %v774_v47 = vmul.f32 %v682_v15, %v608_v35  ;;  %v775_v54 = vmul.f32 %v682_v15, %v612_v56  ;;  %v616_v55 = vpop.permute.xlu1 %615  ;;  %v620_v57 = vpop.permute.xlu0 %619 }
 0x15d   :  { %v686_v59 = vrot.slane %v616_v55, %v2681_v5  ;;  %v690_v2 = vrot.slane %v620_v57, %v2683_v7  ;;  %1487 = vperm.xlu1 %2562, %v2753_v22   ;;  %1523 = vperm.xlu0 %2561, %v2788_v50  }
 0x15e   :  { %v3005_v62 = vadd.f32 %v774_v47, %v566_v12  ;;  %v3007_v63 = vadd.f32 %v775_v54, %v567_v9  ;;  %v2639_v12 = vmov 6  }
 0x15f   :  { %v691_v18 = vsel %vm431_vm0, %v690_v2, %v686_v59 }
 0x160   :  { %v776_v1 = vmul.f32 %v691_v18, %v616_v55  ;;  %v777_v10 = vmul.f32 %v691_v18, %v620_v57  ;;  %v624_v11 = vpop.permute.xlu1 %623  ;;  %v628_v16 = vpop.permute.xlu0 %627 }
 0x161   :  { %v695_v6 = vrot.slane %v624_v11, %v2681_v5  ;;  %v699_v4 = vrot.slane %v628_v16, %v2683_v7  ;;  %1495 = vperm.xlu1 %2562, %v2761_v30   ;;  %1531 = vperm.xlu0 %2561, %v2794_v52  }
 0x162   :  { %v3018_v0 = vadd.f32 %v776_v1, %v568_v17  ;;  %v3020_v48 = vadd.f32 %v777_v10, %v569_v23 }
 0x163   :  { %v700_v26 = vsel %vm431_vm0, %v699_v4, %v695_v6 }
 0x164   :  { %v778_v21 = vmul.f32 %v700_v26, %v624_v11  ;;  %v779_v35 = vmul.f32 %v700_v26, %v628_v16  ;;  %v632_v56 = vpop.permute.xlu1 %631  ;;  %v636_v60 = vpop.permute.xlu0 %635 }
 0x165   :  { %v704_v3 = vrot.slane %v632_v56, %v2681_v5  ;;  %v708_v15 = vrot.slane %v636_v60, %v2683_v7  ;;  %1503 = vperm.xlu1 %2562, %v2770_v36   ;;  %2564 = vset.pattern.permute.xlu0 %v2639_v12 }
 0x166   :  { %v3030_v9 = vadd.f32 %v778_v21, %v570_v24  ;;  %v3032_v47 = vadd.f32 %v779_v35, %v571_v31  ;;  %1699 = vperm.xlu0 %2564, %v2740_v13  }
 0x167   :  { %v709_v33 = vsel %vm431_vm0, %v708_v15, %v704_v3 }
 0x168   :  { %v780_v54 = vmul.f32 %v709_v33, %v632_v56  ;;  %v781_v55 = vmul.f32 %v709_v33, %v636_v60 }
 0x169   :  { %1511 = vperm.xlu1 %2562, %v2777_v44   ;;  %v800_v57 = vpop.permute.xlu1 %799  ;;  %v804_v59 = vpop.permute.xlu0 %803 }
 0x16a   :  { %v3041_v2 = vadd.f32 %v780_v54, %v572_v34  ;;  %v3043_v18 = vadd.f32 %v781_v55, %v573_v39  ;;  %v865_v17 = vrot.slane %v800_v57, %v2681_v5  ;;  %v869_v23 = vrot.slane %v804_v59, %v2683_v7  ;;  %1711 = vperm.xlu0 %2564, %v2753_v22  }
 0x16c   :  { %v870_v42 = vsel %vm431_vm0, %v869_v23, %v865_v17 }
 0x16d   :  { %v990_v1 = vmul.f32 %v870_v42, %v800_v57  ;;  %v991_v41 = vmul.f32 %v870_v42, %v804_v59  ;;  %1519 = vperm.xlu1 %2562, %v2786_v49   ;;  %v808_v53 = vpop.permute.xlu1 %807  ;;  %v816_v10 = vpop.permute.xlu0 %815 }
 0x16e   :  { %1719 = vperm.xlu0 %2564, %v2761_v30   ;;  %v874_v26 = vrot.slane %v808_v53, %v2681_v5 }
 0x16f   :  { %v3052_v11 = vadd.f32 %v990_v1, %v2953_v27  ;;  %v3055_v16 = vadd.f32 %v991_v41, %v2955_v28  ;;  %v883_v28 = vrot.slane %v816_v10, %v2681_v5 }
 0x171   :  { %1527 = vperm.xlu1 %2562, %v2792_v51   ;;  %v812_v6 = vpop.permute.xlu1 %811  ;;  %v824_v4 = vpop.permute.xlu0 %823 }
 0x172   :  { %v878_v24 = vrot.slane %v812_v6, %v2683_v7  ;;  %1727 = vperm.xlu0 %2564, %v2770_v36   ;;  %v892_v57 = vrot.slane %v824_v4, %v2681_v5 }
 0x174   :  { %v879_v31 = vsel %vm431_vm0, %v878_v24, %v874_v26 }
 0x175   :  { %v992_v21 = vmul.f32 %v879_v31, %v808_v53  ;;  %v993_v35 = vmul.f32 %v879_v31, %v812_v6  ;;  %2563 = vset.pattern.permute.xlu1 %v2639_v12  ;;  %v820_v27 = vpop.permute.xlu1 %819  ;;  %v832_v56 = vpop.permute.xlu0 %831 }
 0x176   :  { %v887_v60 = vrot.slane %v820_v27, %v2683_v7  ;;  %v901_v3 = vrot.slane %v832_v56, %v2681_v5  ;;  %1695 = vperm.xlu1 %2563, %v2717_v40   ;;  %1735 = vperm.xlu0 %2564, %v2777_v44  }
 0x177   :  { %v3068_v15 = vadd.f32 %v993_v35, %v2968_v61  ;;  %v3071_v33 = vadd.f32 %v992_v21, %v2966_v58 }
 0x178   :  { %v888_v12 = vsel %vm431_vm0, %v887_v60, %v883_v28  ;;  %v2640_v28 = vmov 7  }
 0x179   :  { %v994_v34 = vmul.f32 %v888_v12, %v816_v10  ;;  %v995_v39 = vmul.f32 %v888_v12, %v820_v27  ;;  %v828_v54 = vpop.permute.xlu1 %827  ;;  %v840_v55 = vpop.permute.xlu0 %839 }
 0x17a   :  { %v896_v59 = vrot.slane %v828_v54, %v2683_v7  ;;  %v910_v17 = vrot.slane %v840_v55, %v2681_v5  ;;  %1703 = vperm.xlu1 %2563, %v2720_v43   ;;  %1743 = vperm.xlu0 %2564, %v2786_v49  }
 0x17b   :  { %v3080_v61 = vadd.f32 %v995_v39, %v2981_v19  ;;  %v3083_v58 = vadd.f32 %v994_v34, %v2979_v8 }
 0x17c   :  { %v897_v23 = vsel %vm431_vm0, %v896_v59, %v892_v57 }
 0x17d   :  { %v996_v42 = vmul.f32 %v897_v23, %v824_v4  ;;  %v997_v1 = vmul.f32 %v897_v23, %v828_v54  ;;  %v836_v41 = vpop.permute.xlu1 %835  ;;  %v848_v53 = vpop.permute.xlu0 %847 }
 0x17e   :  { %v905_v10 = vrot.slane %v836_v41, %v2683_v7  ;;  %v919_v6 = vrot.slane %v848_v53, %v2681_v5  ;;  %1707 = vperm.xlu1 %2563, %v2742_v14   ;;  %1751 = vperm.xlu0 %2564, %v2792_v51  }
 0x17f   :  { %v3091_v19 = vadd.f32 %v997_v1, %v2994_v45  ;;  %v3094_v8 = vadd.f32 %v996_v42, %v2992_v37 }
 0x180   :  { %v906_v26 = vsel %vm431_vm0, %v905_v10, %v901_v3 }
 0x181   :  { %v998_v4 = vmul.f32 %v906_v26, %v832_v56  ;;  %v999_v24 = vmul.f32 %v906_v26, %v836_v41  ;;  %v844_v31 = vpop.permute.xlu1 %843  ;;  %v856_v21 = vpop.permute.xlu0 %855 }
 0x182   :  { %v914_v35 = vrot.slane %v844_v31, %v2683_v7  ;;  %v928_v27 = vrot.slane %v856_v21, %v2681_v5  ;;  %1715 = vperm.xlu1 %2563, %v2756_v25   ;;  %2565 = vset.pattern.permute.xlu0 %v2640_v28 }
 0x183   :  { %v3102_v45 = vadd.f32 %v999_v24, %v3007_v63  ;;  %1919 = vperm.xlu0 %2565, %v2717_v40   ;;  %v3106_v37 = vadd.f32 %v998_v4, %v3005_v62 }
 0x184   :  { %v915_v56 = vsel %vm431_vm0, %v914_v35, %v910_v17 }
 0x185   :  { %v1000_v60 = vmul.f32 %v915_v56, %v840_v55  ;;  %v1001_v3 = vmul.f32 %v915_v56, %v844_v31  ;;  %v852_v12 = vpop.permute.xlu1 %851 }
 0x186   :  { %v923_v34 = vrot.slane %v852_v12, %v2683_v7  ;;  %1723 = vperm.xlu1 %2563, %v2764_v32   ;;  %v1024_v39 = vpop.permute.xlu0 %1023 }
 0x187   :  { %v3112_v54 = vadd.f32 %v1001_v3, %v3020_v48  ;;  %v1089_v63 = vrot.slane %v1024_v39, %v2681_v5  ;;  %1931 = vperm.xlu0 %2565, %v2742_v14   ;;  %v3117_v40 = vadd.f32 %v1000_v60, %v3018_v0 }
 0x188   :  { %v924_v62 = vsel %vm431_vm0, %v923_v34, %v919_v6 }
 0x189   :  { %v1002_v55 = vmul.f32 %v924_v62, %v848_v53  ;;  %v1003_v57 = vmul.f32 %v924_v62, %v852_v12  ;;  %v860_v59 = vpop.permute.xlu1 %859 }
 0x18a   :  { %v932_v17 = vrot.slane %v860_v59, %v2683_v7  ;;  %1731 = vperm.xlu1 %2563, %v2772_v38   ;;  %v1036_v23 = vpop.permute.xlu0 %1035 }
 0x18b   :  { %v3123_v48 = vadd.f32 %v1003_v57, %v3032_v47  ;;  %v1102_v42 = vrot.slane %v1036_v23, %v2683_v7  ;;  %1939 = vperm.xlu0 %2565, %v2756_v25   ;;  %v3128_v14 = vadd.f32 %v1002_v55, %v3030_v9 }
 0x18c   :  { %v933_v0 = vsel %vm431_vm0, %v932_v17, %v928_v27 }
 0x18d   :  { %v1004_v1 = vmul.f32 %v933_v0, %v856_v21  ;;  %v1005_v41 = vmul.f32 %v933_v0, %v860_v59 }
 0x18e   :  { %1739 = vperm.xlu1 %2563, %v2780_v46   ;;  %v1028_v53 = vpop.permute.xlu1 %1027  ;;  %v1044_v10 = vpop.permute.xlu0 %1043 }
 0x18f   :  { %v3133_v6 = vadd.f32 %v1005_v41, %v3043_v18  ;;  %v1093_v47 = vrot.slane %v1028_v53, %v2683_v7  ;;  %v1111_v26 = vrot.slane %v1044_v10, %v2683_v7  ;;  %1947 = vperm.xlu0 %2565, %v2764_v32   ;;  %v3139_v25 = vadd.f32 %v1004_v1, %v3041_v2 }
 0x191   :  { %v1094_v9 = vsel %vm431_vm0, %v1093_v47, %v1089_v63 }
 0x192   :  { %v1214_v4 = vmul.f32 %v1094_v9, %v1024_v39  ;;  %v1215_v24 = vmul.f32 %v1094_v9, %v1028_v53  ;;  %1747 = vperm.xlu1 %2563, %v2788_v50   ;;  %v1032_v31 = vpop.permute.xlu1 %1031  ;;  %v1052_v21 = vpop.permute.xlu0 %1051 }
 0x193   :  { %v1098_v18 = vrot.slane %v1032_v31, %v2681_v5  ;;  %v1120_v35 = vrot.slane %v1052_v21, %v2683_v7  ;;  %1955 = vperm.xlu0 %2565, %v2772_v38  }
 0x194   :  { %v3147_v27 = vadd.f32 %v1215_v24, %v3055_v16  ;;  %v3150_v32 = vadd.f32 %v1214_v4, %v3052_v11 }
 0x195   :  { %v1103_v2 = vsel %vm431_vm0, %v1102_v42, %v1098_v18 }
 0x196   :  { %v1216_v56 = vmul.f32 %v1103_v2, %v1032_v31  ;;  %v1217_v60 = vmul.f32 %v1103_v2, %v1036_v23  ;;  %1755 = vperm.xlu1 %2563, %v2794_v52   ;;  %v1040_v3 = vpop.permute.xlu1 %1039  ;;  %v1060_v12 = vpop.permute.xlu0 %1059 }
 0x197   :  { %v1107_v34 = vrot.slane %v1040_v3, %v2681_v5  ;;  %v1129_v39 = vrot.slane %v1060_v12, %v2683_v7  ;;  %1963 = vperm.xlu0 %2565, %v2780_v46  }
 0x198   :  { %v3158_v38 = vadd.f32 %v1216_v56, %v3071_v33  ;;  %v3161_v11 = vadd.f32 %v1217_v60, %v3068_v15 }
 0x199   :  { %v1112_v16 = vsel %vm431_vm0, %v1111_v26, %v1107_v34 }
 0x19a   :  { %v1218_v63 = vmul.f32 %v1112_v16, %v1040_v3  ;;  %v1219_v62 = vmul.f32 %v1112_v16, %v1044_v10  ;;  %2566 = vset.pattern.permute.xlu1 %v2640_v28  ;;  %v1048_v55 = vpop.permute.xlu1 %1047  ;;  %v1068_v57 = vpop.permute.xlu0 %1067 }
 0x19b   :  { %v1116_v59 = vrot.slane %v1048_v55, %v2681_v5  ;;  %v1138_v17 = vrot.slane %v1068_v57, %v2683_v7  ;;  %1923 = vperm.xlu1 %2566, %v2740_v13   ;;  %1971 = vperm.xlu0 %2565, %v2788_v50  }
 0x19c   :  { %v3170_v46 = vadd.f32 %v1218_v63, %v3083_v58  ;;  %v3173_v15 = vadd.f32 %v1219_v62, %v3080_v61 }
 0x19d   :  { %v1121_v33 = vsel %vm431_vm0, %v1120_v35, %v1116_v59 }
 0x19e   :  { %v1220_v23 = vmul.f32 %v1121_v33, %v1048_v55  ;;  %v1221_v28 = vmul.f32 %v1121_v33, %v1052_v21  ;;  %v1056_v42 = vpop.permute.xlu1 %1055  ;;  %v1076_v0 = vpop.permute.xlu0 %1075 }
 0x19f   :  { %v1125_v1 = vrot.slane %v1056_v42, %v2681_v5  ;;  %v1147_v41 = vrot.slane %v1076_v0, %v2683_v7  ;;  %1927 = vperm.xlu1 %2566, %v2720_v43   ;;  %1979 = vperm.xlu0 %2565, %v2794_v52  }
 0x1a0   :  { %v3181_v13 = vadd.f32 %v1220_v23, %v3094_v8  ;;  %v3184_v50 = vadd.f32 %v1221_v28, %v3091_v19 }
 0x1a1   :  { %v1130_v61 = vsel %vm431_vm0, %v1129_v39, %v1125_v1 }
 0x1a2   :  { %v1222_v58 = vmul.f32 %v1130_v61, %v1056_v42  ;;  %v1223_v53 = vmul.f32 %v1130_v61, %v1060_v12  ;;  %v1064_v10 = vpop.permute.xlu1 %1063  ;;  %v1084_v47 = vpop.permute.xlu0 %1083 }
 0x1a3   :  { %v1134_v26 = vrot.slane %v1064_v10, %v2681_v5  ;;  %v1156_v9 = vrot.slane %v1084_v47, %v2683_v7  ;;  %1935 = vperm.xlu1 %2566, %v2753_v22  }
 0x1a4   :  { %v3191_v43 = vadd.f32 %v1222_v58, %v3106_v37  ;;  %v3194_v52 = vadd.f32 %v1223_v53, %v3102_v45 }
 0x1a5   :  { %v1139_v19 = vsel %vm431_vm0, %v1138_v17, %v1134_v26 }
 0x1a6   :  { %v1224_v8 = vmul.f32 %v1139_v19, %v1064_v10  ;;  %v1225_v4 = vmul.f32 %v1139_v19, %v1068_v57  ;;  %v1072_v24 = vpop.permute.xlu1 %1071 }
 0x1a7   :  { %v1143_v31 = vrot.slane %v1072_v24, %v2681_v5  ;;  %1943 = vperm.xlu1 %2566, %v2761_v30   ;;  %v1252_v21 = vpop.permute.xlu0 %1251 }
 0x1a8   :  { %v3200_v18 = vadd.f32 %v1224_v8, %v3117_v40  ;;  %v1317_v22 = vrot.slane %v1252_v21, %v2683_v7  ;;  %v3204_v37 = vadd.f32 %v1225_v4, %v3112_v54 }
 0x1a9   :  { %v1148_v45 = vsel %vm431_vm0, %v1147_v41, %v1143_v31 }
 0x1aa   :  { %v1226_v35 = vmul.f32 %v1148_v45, %v1072_v24  ;;  %v1227_v2 = vmul.f32 %v1148_v45, %v1076_v0  ;;  %v1080_v56 = vpop.permute.xlu1 %1079 }
 0x1ab   :  { %v1152_v60 = vrot.slane %v1080_v56, %v2681_v5  ;;  %1951 = vperm.xlu1 %2566, %v2770_v36   ;;  %v1264_v3 = vpop.permute.xlu0 %1263 }
 0x1ac   :  { %v3210_v30 = vadd.f32 %v1226_v35, %v3128_v14  ;;  %v1331_v40 = vrot.slane %v1264_v3, %v2681_v5  ;;  %v3214_v12 = vadd.f32 %v1227_v2, %v3123_v48 }
 0x1ad   :  { %v1157_v54 = vsel %vm431_vm0, %v1156_v9, %v1152_v60 }
 0x1ae   :  { %v1228_v34 = vmul.f32 %v1157_v54, %v1080_v56  ;;  %v1229_v39 = vmul.f32 %v1157_v54, %v1084_v47 }
 0x1af   :  { %1959 = vperm.xlu1 %2566, %v2777_v44   ;;  %v1248_v16 = vpop.permute.xlu1 %1247  ;;  %v1272_v63 = vpop.permute.xlu0 %1271 }
 0x1b0   :  { %v3219_v62 = vadd.f32 %v1228_v34, %v3139_v25  ;;  %v1313_v36 = vrot.slane %v1248_v16, %v2681_v5  ;;  %v1340_v14 = vrot.slane %v1272_v63, %v2681_v5  ;;  %v3224_v55 = vadd.f32 %v1229_v39, %v3133_v6 }
 0x1b2   :  { %v1318_v48 = vsel %vm431_vm0, %v1317_v22, %v1313_v36 }
 0x1b3   :  { %v1438_v57 = vmul.f32 %v1318_v48, %v1248_v16  ;;  %v1439_v59 = vmul.f32 %v1318_v48, %v1252_v21  ;;  %1967 = vperm.xlu1 %2566, %v2786_v49   ;;  %v1256_v17 = vpop.permute.xlu1 %1255  ;;  %v1280_v44 = vpop.permute.xlu0 %1279 }
 0x1b4   :  { %v1322_v33 = vrot.slane %v1256_v17, %v2681_v5  ;;  %v1349_v25 = vrot.slane %v1280_v44, %v2681_v5 }
 0x1b5   :  { %v3231_v23 = vadd.f32 %v1438_v57, %v3150_v32  ;;  %v3234_v28 = vadd.f32 %v1439_v59, %v3147_v27 }
 0x1b7   :  { %1975 = vperm.xlu1 %2566, %v2792_v51   ;;  %v1260_v6 = vpop.permute.xlu1 %1259  ;;  %v1288_v42 = vpop.permute.xlu0 %1287 }
 0x1b8   :  { %v1326_v0 = vrot.slane %v1260_v6, %v2683_v7  ;;  %v1358_v49 = vrot.slane %v1288_v42, %v2681_v5 }
 0x1ba   :  { %v1327_v1 = vsel %vm431_vm0, %v1326_v0, %v1322_v33 }
 0x1bb   :  { %v1440_v41 = vmul.f32 %v1327_v1, %v1256_v17  ;;  %v1441_v61 = vmul.f32 %v1327_v1, %v1260_v6  ;;  %v1268_v58 = vpop.permute.xlu1 %1267  ;;  %v1296_v53 = vpop.permute.xlu0 %1295 }
 0x1bc   :  { %v1335_v32 = vrot.slane %v1268_v58, %v2683_v7  ;;  %v1367_v10 = vrot.slane %v1296_v53, %v2681_v5 }
 0x1bd   :  { %v3243_v27 = vadd.f32 %v1441_v61, %v3161_v11  ;;  %v3246_v51 = vadd.f32 %v1440_v41, %v3158_v38 }
 0x1be   :  { %v1336_v47 = vsel %vm431_vm0, %v1335_v32, %v1331_v40 }
 0x1bf   :  { %v1442_v26 = vmul.f32 %v1336_v47, %v1264_v3  ;;  %v1443_v9 = vmul.f32 %v1336_v47, %v1268_v58  ;;  %v1276_v19 = vpop.permute.xlu1 %1275  ;;  %v1304_v8 = vpop.permute.xlu0 %1303 }
 0x1c0   :  { %v1344_v4 = vrot.slane %v1276_v19, %v2683_v7  ;;  %v1376_v24 = vrot.slane %v1304_v8, %v2681_v5 }
 0x1c1   :  { %v3252_v31 = vadd.f32 %v1443_v9, %v3173_v15  ;;  %v3255_v21 = vadd.f32 %v1442_v26, %v3170_v46 }
 0x1c2   :  { %v1345_v11 = vsel %vm431_vm0, %v1344_v4, %v1340_v14 }
 0x1c3   :  { %v1444_v38 = vmul.f32 %v1345_v11, %v1272_v63  ;;  %v1445_v22 = vmul.f32 %v1345_v11, %v1276_v19  ;;  %v1284_v45 = vpop.permute.xlu1 %1283 }
 0x1c4   :  { %v1353_v35 = vrot.slane %v1284_v45, %v2683_v7  ;;  %v1472_v2 = vpop.permute.xlu0 %1471 }
 0x1c5   :  { %v3260_v56 = vadd.f32 %v1445_v22, %v3184_v50  ;;  %v1537_v60 = vrot.slane %v1472_v2, %v2681_v5  ;;  %v3264_v3 = vadd.f32 %v1444_v38, %v3181_v13 }
 0x1c6   :  { %v1354_v15 = vsel %vm431_vm0, %v1353_v35, %v1349_v25 }
 0x1c7   :  { %v1446_v46 = vmul.f32 %v1354_v15, %v1280_v44  ;;  %v1447_v40 = vmul.f32 %v1354_v15, %v1284_v45  ;;  %v1292_v54 = vpop.permute.xlu1 %1291 }
 0x1c8   :  { %v1362_v34 = vrot.slane %v1292_v54, %v2683_v7  ;;  %v1484_v39 = vpop.permute.xlu0 %1483 }
 0x1c9   :  { %v3269_v16 = vadd.f32 %v1447_v40, %v3194_v52  ;;  %v1550_v63 = vrot.slane %v1484_v39, %v2683_v7  ;;  %v3273_v50 = vadd.f32 %v1446_v46, %v3191_v43 }
 0x1ca   :  { %v1363_v36 = vsel %vm431_vm0, %v1362_v34, %v1358_v49 }
 0x1cb   :  { %v1448_v13 = vmul.f32 %v1363_v36, %v1288_v42  ;;  %v1449_v14 = vmul.f32 %v1363_v36, %v1292_v54  ;;  %v1300_v48 = vpop.permute.xlu1 %1299 }
 0x1cc   :  { %v1371_v57 = vrot.slane %v1300_v48, %v2683_v7  ;;  %v1492_v59 = vpop.permute.xlu0 %1491 }
 0x1cd   :  { %v3278_v17 = vadd.f32 %v1449_v14, %v3204_v37  ;;  %v1559_v44 = vrot.slane %v1492_v59, %v2683_v7  ;;  %v3282_v52 = vadd.f32 %v1448_v13, %v3200_v18 }
 0x1ce   :  { %v1372_v33 = vsel %vm431_vm0, %v1371_v57, %v1367_v10 }
 0x1cf   :  { %v1450_v43 = vmul.f32 %v1372_v33, %v1296_v53  ;;  %v1451_v25 = vmul.f32 %v1372_v33, %v1300_v48  ;;  %v1308_v6 = vpop.permute.xlu1 %1307 }
 0x1d0   :  { %v1380_v42 = vrot.slane %v1308_v6, %v2683_v7  ;;  %v1500_v0 = vpop.permute.xlu0 %1499 }
 0x1d1   :  { %v3287_v49 = vadd.f32 %v1451_v25, %v3214_v12  ;;  %v1568_v1 = vrot.slane %v1500_v0, %v2683_v7  ;;  %v3291_v37 = vadd.f32 %v1450_v43, %v3210_v30 }
 0x1d2   :  { %v1381_v41 = vsel %vm431_vm0, %v1380_v42, %v1376_v24 }
 0x1d3   :  { %v1452_v18 = vmul.f32 %v1381_v41, %v1304_v8  ;;  %v1453_v61 = vmul.f32 %v1381_v41, %v1308_v6 }
 0x1d4   :  { %v1476_v58 = vpop.permute.xlu1 %1475  ;;  %v1508_v32 = vpop.permute.xlu0 %1507 }
 0x1d5   :  { %v3295_v53 = vadd.f32 %v1453_v61, %v3224_v55  ;;  %v1541_v10 = vrot.slane %v1476_v58, %v2683_v7  ;;  %v1577_v47 = vrot.slane %v1508_v32, %v2683_v7  ;;  %v3300_v12 = vadd.f32 %v1452_v18, %v3219_v62 }
 0x1d7   :  { %v1542_v26 = vsel %vm431_vm0, %v1541_v10, %v1537_v60 }
 0x1d8   :  { %v1662_v30 = vmul.f32 %v1542_v26, %v1472_v2  ;;  %v1663_v9 = vmul.f32 %v1542_v26, %v1476_v58  ;;  %v1480_v19 = vpop.permute.xlu1 %1479  ;;  %v1516_v4 = vpop.permute.xlu0 %1515 }
 0x1d9   :  { %v1546_v8 = vrot.slane %v1480_v19, %v2681_v5  ;;  %v1586_v24 = vrot.slane %v1516_v4, %v2683_v7 }
 0x1da   :  { %v3306_v55 = vadd.f32 %v1663_v9, %v3234_v28  ;;  %v3309_v11 = vadd.f32 %v1662_v30, %v3231_v23 }
 0x1db   :  { %v1551_v38 = vsel %vm431_vm0, %v1550_v63, %v1546_v8 }
 0x1dc   :  { %v1664_v62 = vmul.f32 %v1551_v38, %v1480_v19  ;;  %v1665_v22 = vmul.f32 %v1551_v38, %v1484_v39  ;;  %v1488_v45 = vpop.permute.xlu1 %1487  ;;  %v1524_v35 = vpop.permute.xlu0 %1523 }
 0x1dd   :  { %v1555_v2 = vrot.slane %v1488_v45, %v2681_v5  ;;  %v1595_v41 = vrot.slane %v1524_v35, %v2683_v7 }
 0x1de   :  { %v3314_v60 = vadd.f32 %v1664_v62, %v3246_v51  ;;  %v3317_v15 = vadd.f32 %v1665_v22, %v3243_v27 }
 0x1df   :  { %v1560_v28 = vsel %vm431_vm0, %v1559_v44, %v1555_v2 }
 0x1e0   :  { %v1666_v46 = vmul.f32 %v1560_v28, %v1488_v45  ;;  %v1667_v40 = vmul.f32 %v1560_v28, %v1492_v59  ;;  %v1496_v23 = vpop.permute.xlu1 %1495  ;;  %v1532_v54 = vpop.permute.xlu0 %1531 }
 0x1e1   :  { %v1564_v34 = vrot.slane %v1496_v23, %v2681_v5  ;;  %v1604_v26 = vrot.slane %v1532_v54, %v2683_v7 }
 0x1e2   :  { %v3322_v39 = vadd.f32 %v1666_v46, %v3255_v21  ;;  %v3325_v63 = vadd.f32 %v1667_v40, %v3252_v31 }
 0x1e3   :  { %v1569_v51 = vsel %vm431_vm0, %v1568_v1, %v1564_v34 }
 0x1e4   :  { %v1668_v36 = vmul.f32 %v1569_v51, %v1496_v23  ;;  %v1669_v13 = vmul.f32 %v1569_v51, %v1500_v0  ;;  %v1504_v27 = vpop.permute.xlu1 %1503 }
 0x1e5   :  { %v1573_v14 = vrot.slane %v1504_v27, %v2681_v5  ;;  %v1700_v48 = vpop.permute.xlu0 %1699 }
 0x1e6   :  { %v3330_v57 = vadd.f32 %v1668_v36, %v3264_v3  ;;  %v3333_v59 = vadd.f32 %v1669_v13, %v3260_v56  ;;  %v1765_v38 = vrot.slane %v1700_v48, %v2683_v7 }
 0x1e7   :  { %v1578_v21 = vsel %vm431_vm0, %v1577_v47, %v1573_v14 }
 0x1e8   :  { %v1670_v44 = vmul.f32 %v1578_v21, %v1504_v27  ;;  %v1671_v33 = vmul.f32 %v1578_v21, %v1508_v32  ;;  %v1512_v31 = vpop.permute.xlu1 %1511 }
 0x1e9   :  { %v1582_v43 = vrot.slane %v1512_v31, %v2681_v5  ;;  %v1712_v25 = vpop.permute.xlu0 %1711 }
 0x1ea   :  { %v3338_v6 = vadd.f32 %v1670_v44, %v3273_v50  ;;  %v3341_v42 = vadd.f32 %v1671_v33, %v3269_v16  ;;  %v1779_v27 = vrot.slane %v1712_v25, %v2681_v5 }
 0x1eb   :  { %v1587_v3 = vsel %vm431_vm0, %v1586_v24, %v1582_v43 }
 0x1ec   :  { %v1672_v0 = vmul.f32 %v1587_v3, %v1512_v31  ;;  %v1673_v1 = vmul.f32 %v1587_v3, %v1516_v4  ;;  %v1520_v56 = vpop.permute.xlu1 %1519 }
 0x1ed   :  { %v1591_v18 = vrot.slane %v1520_v56, %v2681_v5  ;;  %v1720_v61 = vpop.permute.xlu0 %1719 }
 0x1ee   :  { %v3347_v58 = vadd.f32 %v1672_v0, %v3282_v52  ;;  %v3350_v32 = vadd.f32 %v1673_v1, %v3278_v17  ;;  %v1788_v43 = vrot.slane %v1720_v61, %v2681_v5 }
 0x1ef   :  { %v1596_v50 = vsel %vm431_vm0, %v1595_v41, %v1591_v18 }
 0x1f0   :  { %v1674_v16 = vmul.f32 %v1596_v50, %v1520_v56  ;;  %v1675_v10 = vmul.f32 %v1596_v50, %v1524_v35  ;;  %v1528_v47 = vpop.permute.xlu1 %1527 }
 0x1f1   :  { %v1600_v30 = vrot.slane %v1528_v47, %v2681_v5  ;;  %v1728_v9 = vpop.permute.xlu0 %1727 }
 0x1f2   :  { %v3356_v19 = vadd.f32 %v1674_v16, %v3291_v37  ;;  %v3359_v4 = vadd.f32 %v1675_v10, %v3287_v49 }
 0x1f3   :  { %v1605_v52 = vsel %vm431_vm0, %v1604_v26, %v1600_v30 }
 0x1f4   :  { %v1676_v17 = vmul.f32 %v1605_v52, %v1528_v47  ;;  %v1677_v8 = vmul.f32 %v1605_v52, %v1532_v54 }
 0x1f5   :  { %v1696_v24 = vpop.permute.xlu1 %1695  ;;  %v1736_v37 = vpop.permute.xlu0 %1735 }
 0x1f6   :  { %v3364_v62 = vadd.f32 %v1676_v17, %v3300_v12  ;;  %v1761_v22 = vrot.slane %v1696_v24, %v2681_v5  ;;  %v3368_v45 = vadd.f32 %v1677_v8, %v3295_v53  ;;  %v1806_v30 = vrot.slane %v1736_v37, %v2681_v5 }
 0x1f8   :  { %v1766_v35 = vsel %vm431_vm0, %v1765_v38, %v1761_v22 }
 0x1f9   :  { %v1886_v49 = vmul.f32 %v1766_v35, %v1696_v24  ;;  %v1887_v2 = vmul.f32 %v1766_v35, %v1700_v48  ;;  %v1704_v28 = vpop.permute.xlu1 %1703  ;;  %v1744_v23 = vpop.permute.xlu0 %1743 }
 0x1fa   :  { %v1770_v54 = vrot.slane %v1704_v28, %v2681_v5 }
 0x1fb   :  { %v3372_v46 = vadd.f32 %v1886_v49, %v3309_v11  ;;  %v3375_v40 = vadd.f32 %v1887_v2, %v3306_v55 }
 0x1fd   :  { %v1708_v12 = vpop.permute.xlu1 %1707  ;;  %v1752_v55 = vpop.permute.xlu0 %1751 }
 0x1fe   :  { %v1774_v34 = vrot.slane %v1708_v12, %v2683_v7 }
 0x200   :  { %v1775_v53 = vsel %vm431_vm0, %v1774_v34, %v1770_v54 }
 0x201   :  { %v1888_v51 = vmul.f32 %v1775_v53, %v1704_v28  ;;  %v1889_v36 = vmul.f32 %v1775_v53, %v1708_v12  ;;  %v1716_v13 = vpop.permute.xlu1 %1715 }
 0x202   :  { %v1783_v14 = vrot.slane %v1716_v13, %v2683_v7  ;;  %v1920_v56 = vpop.permute.xlu0 %1919 }
 0x203   :  { %v3383_v11 = vadd.f32 %v1889_v36, %v3317_v15  ;;  %v3386_v48 = vadd.f32 %v1888_v51, %v3314_v60 }
 0x204   :  { %v1784_v21 = vsel %vm431_vm0, %v1783_v14, %v1779_v27 }
 0x205   :  { %v1890_v44 = vmul.f32 %v1784_v21, %v1712_v25  ;;  %v1891_v33 = vmul.f32 %v1784_v21, %v1716_v13  ;;  %v1724_v31 = vpop.permute.xlu1 %1723  ;;  %v1797_v25 = vrot.slane %v1728_v9, %v2681_v5  ;;  %v1985_v13 = vrot.slane %v1920_v56, %v2681_v5 }
 0x206   :  { %v1792_v3 = vrot.slane %v1724_v31, %v2683_v7  ;;  %v1932_v52 = vpop.permute.xlu0 %1931 }
 0x207   :  { %v3392_v0 = vadd.f32 %v1891_v33, %v3325_v63  ;;  %v3395_v1 = vadd.f32 %v1890_v44, %v3322_v39 }
 0x208   :  { %v1793_v15 = vsel %vm431_vm0, %v1792_v3, %v1788_v43 }
 0x209   :  { %v1892_v60 = vmul.f32 %v1793_v15, %v1720_v61  ;;  %v1893_v41 = vmul.f32 %v1793_v15, %v1724_v31  ;;  %v1732_v18 = vpop.permute.xlu1 %1731 }
 0x20a   :  { %v1801_v50 = vrot.slane %v1732_v18, %v2683_v7  ;;  %v1940_v2 = vpop.permute.xlu0 %1939 }
 0x20b   :  { %v3401_v16 = vadd.f32 %v1893_v41, %v3333_v59  ;;  %v3404_v10 = vadd.f32 %v1892_v60, %v3330_v57 }
 0x20c   :  { %v1802_v63 = vsel %vm431_vm0, %v1801_v50, %v1797_v25 }
 0x20d   :  { %v1894_v39 = vmul.f32 %v1802_v63, %v1728_v9  ;;  %v1895_v47 = vmul.f32 %v1802_v63, %v1732_v18  ;;  %v1740_v26 = vpop.permute.xlu1 %1739  ;;  %v1815_v9 = vrot.slane %v1744_v23, %v2681_v5  ;;  %v2007_v18 = vrot.slane %v1940_v2, %v2683_v7 }
 0x20e   :  { %v1810_v61 = vrot.slane %v1740_v26, %v2683_v7 }
 0x20f   :  { %v3410_v17 = vadd.f32 %v1895_v47, %v3341_v42  ;;  %v3413_v8 = vadd.f32 %v1894_v39, %v3338_v6 }
 0x210   :  { %v1811_v59 = vsel %vm431_vm0, %v1810_v61, %v1806_v30 }
 0x211   :  { %v1896_v57 = vmul.f32 %v1811_v59, %v1736_v37  ;;  %v1897_v24 = vmul.f32 %v1811_v59, %v1740_v26  ;;  %v1748_v38 = vpop.permute.xlu1 %1747  ;;  %v1824_v37 = vrot.slane %v1752_v55, %v2681_v5 }
 0x212   :  { %v1819_v22 = vrot.slane %v1748_v38, %v2683_v7 }
 0x213   :  { %v3419_v35 = vadd.f32 %v1897_v24, %v3350_v32  ;;  %v3422_v49 = vadd.f32 %v1896_v57, %v3347_v58 }
 0x214   :  { %v1820_v42 = vsel %vm431_vm0, %v1819_v22, %v1815_v9 }
 0x215   :  { %v1898_v6 = vmul.f32 %v1820_v42, %v1744_v23  ;;  %v1899_v28 = vmul.f32 %v1820_v42, %v1748_v38  ;;  %v1756_v12 = vpop.permute.xlu1 %1755  ;;  %v1948_v23 = vpop.permute.xlu0 %1947 }
 0x216   :  { %v1828_v54 = vrot.slane %v1756_v12, %v2683_v7 }
 0x217   :  { %v3428_v34 = vadd.f32 %v1899_v28, %v3359_v4  ;;  %v3431_v53 = vadd.f32 %v1898_v6, %v3356_v19 }
 0x218   :  { %v1829_v32 = vsel %vm431_vm0, %v1828_v54, %v1824_v37 }
 0x219   :  { %v1900_v58 = vmul.f32 %v1829_v32, %v1752_v55  ;;  %v1901_v51 = vmul.f32 %v1829_v32, %v1756_v12  ;;  %v1998_v55 = vrot.slane %v1932_v52, %v2683_v7 }
 0x21a   :  { %v1924_v36 = vpop.permute.xlu1 %1923 }
 0x21b   :  { %v3436_v27 = vadd.f32 %v1901_v51, %v3368_v45  ;;  %v1989_v14 = vrot.slane %v1924_v36, %v2683_v7  ;;  %v3440_v21 = vadd.f32 %v1900_v58, %v3364_v62  ;;  %v1956_v45 = vpop.permute.xlu0 %1955 }
 0x21c   :  { %v2025_v42 = vrot.slane %v1956_v45, %v2683_v7 }
 0x21d   :  { %v1990_v4 = vsel %vm431_vm0, %v1989_v14, %v1985_v13 }
 0x21e   :  { %v2110_v19 = vmul.f32 %v1990_v4, %v1920_v56  ;;  %v2111_v44 = vmul.f32 %v1990_v4, %v1924_v36  ;;  %v1928_v33 = vpop.permute.xlu1 %1927 }
 0x21f   :  { %v1994_v31 = vrot.slane %v1928_v33, %v2681_v5  ;;  %v1964_v26 = vpop.permute.xlu0 %1963 }
 0x220   :  { %v2126_v43 = vadd.f32 %v2110_v19, %v3372_v46  ;;  %v2127_v3 = vadd.f32 %v2111_v44, %v3375_v40  ;;  %v2016_v40 = vrot.slane %v1948_v23, %v2683_v7  ;;  %v2034_v19 = vrot.slane %v1964_v26, %v2683_v7 }
 0x221   :  { %v1999_v15 = vsel %vm431_vm0, %v1998_v55, %v1994_v31 }
 0x222   :  { %v2112_v60 = vmul.f32 %v1999_v15, %v1928_v33  ;;  %v2113_v41 = vmul.f32 %v1999_v15, %v1932_v52  ;;  %v1936_v62 = vpop.permute.xlu1 %1935  ;;  %v2142_v59 = vmul.f32 0.14285715, %v2126_v43  ;;  %v2143_v57 = vmul.f32 0.14285715, %v2127_v3 }
 0x223   :  { %v2003_v56 = vrot.slane %v1936_v62, %v2681_v5 }
 0x224   :  { %v2128_v25 = vadd.f32 %v2112_v60, %v3386_v48  ;;  %v2129_v50 = vadd.f32 %v2113_v41, %v3383_v11 }
 0x225   :  { %v2008_v63 = vsel %vm431_vm0, %v2007_v18, %v2003_v56 }
 0x226   :  { %v2114_v39 = vmul.f32 %v2008_v63, %v1936_v62  ;;  %v2115_v46 = vmul.f32 %v2008_v63, %v1940_v2  ;;  %v1944_v47 = vpop.permute.xlu1 %1943  ;;  %v2144_v58 = vmul.f32 0.14285715, %v2128_v25  ;;  %v2145_v51 = vmul.f32 0.14285715, %v2129_v50 }
 0x227   :  { %v2012_v30 = vrot.slane %v1944_v47, %v2681_v5 }
 0x228   :  { %v2130_v61 = vadd.f32 %v2114_v39, %v3395_v1  ;;  %v2131_v52 = vadd.f32 %v2115_v46, %v3392_v0  ;;  %v1972_v1 = vpop.permute.xlu0 %1971 }
 0x229   :  { %v2017_v48 = vsel %vm431_vm0, %v2016_v40, %v2012_v30  ;;  %v2043_v44 = vrot.slane %v1972_v1, %v2683_v7 }
 0x22a   :  { %v2146_v24 = vmul.f32 0.14285715, %v2130_v61  ;;  %v2147_v11 = vmul.f32 0.14285715, %v2131_v52  ;;  %v2116_v38 = vmul.f32 %v2017_v48, %v1944_v47  ;;  %v2117_v9 = vmul.f32 %v2017_v48, %v1948_v23  ;;  %v1952_v22 = vpop.permute.xlu1 %1951 }
 0x22b   :  { %v2021_v2 = vrot.slane %v1952_v22, %v2681_v5 }
 0x22c   :  { %v2158_v6 = vcombine.low %v2142_v59, %v2146_v24  ;;  %v2159_v28 = vcombine.high %v2142_v59, %v2146_v24  ;;  %v2294_v12 = vcombine.low %v2143_v57, %v2147_v11  ;;  %v2295_v37 = vcombine.high %v2143_v57, %v2147_v11  ;;  %v1980_v25 = vpop.permute.xlu0 %1979 }
 0x22d   :  { %v2132_v0 = vadd.f32 %v2116_v38, %v3404_v10  ;;  %v2133_v54 = vadd.f32 %v2117_v9, %v3401_v16  ;;  %v2026_v32 = vsel %vm431_vm0, %v2025_v42, %v2021_v2  ;;  %v2052_v48 = vrot.slane %v1980_v25, %v2683_v7 }
 0x22e   :  { %v1960_v36 = vpop.permute.xlu1 %1959  ;;  %v2118_v14 = vmul.f32 %v2026_v32, %v1952_v22  ;;  %v2119_v4 = vmul.f32 %v2026_v32, %v1956_v45  ;;  %v2166_v16 = vrot.slane %v2158_v6, %v2702_v20  ;;  %v2173_v45 = vrot.slane %v2159_v28, %v2702_v20 }
 0x22f   :  { %v2148_v13 = vmul.f32 0.14285715, %v2132_v0  ;;  %v2149_v23 = vmul.f32 0.14285715, %v2133_v54  ;;  %v2030_v33 = vrot.slane %v1960_v36, %v2681_v5  ;;  %v2302_v50 = vrot.slane %v2294_v12, %v2702_v20 }
 0x230   :  { %v2134_v3 = vadd.f32 %v2118_v14, %v3413_v8  ;;  %v2135_v15 = vadd.f32 %v2119_v4, %v3410_v17  ;;  %v2309_v38 = vrot.slane %v2295_v37, %v2702_v20 }
 0x231   :  { %v2174_v55 = vcombine.low %v2144_v58, %v2148_v13  ;;  %v2175_v31 = vcombine.high %v2144_v58, %v2148_v13  ;;  %v2310_v10 = vcombine.low %v2145_v51, %v2149_v23  ;;  %v2311_v43 = vcombine.high %v2145_v51, %v2149_v23 }
 0x232   :  { %v2035_v60 = vsel %vm431_vm0, %v2034_v19, %v2030_v33  ;;  %v1968_v41 = vpop.permute.xlu1 %1967  ;;  %v2151_v28 = vmul.f32 0.14285715, %v2135_v15 }
 0x233   :  { %v2182_v62 = vrot.slane %v2174_v55, %v2702_v20  ;;  %v2189_v18 = vrot.slane %v2175_v31, %v2702_v20  ;;  %v2318_v56 = vrot.slane %v2310_v10, %v2702_v20  ;;  %v2325_v63 = vrot.slane %v2311_v43, %v2702_v20 }
 0x234   :  { %v2120_v39 = vmul.f32 %v2035_v60, %v1960_v36  ;;  %v2121_v8 = vmul.f32 %v2035_v60, %v1964_v26  ;;  %v2039_v52 = vrot.slane %v1968_v41, %v2681_v5 }
 0x235   :  { %v2222_v46 = vcombine.low %v2166_v16, %v2182_v62  ;;  %v2223_v17 = vcombine.high %v2166_v16, %v2182_v62  ;;  %v2238_v47 = vcombine.low %v2173_v45, %v2189_v18  ;;  %v2239_v40 = vcombine.high %v2173_v45, %v2189_v18 }
 0x236   :  { %v2136_v30 = vadd.f32 %v2120_v39, %v3422_v49  ;;  %v2137_v61 = vadd.f32 %v2121_v8, %v3419_v35  ;;  %v1976_v59 = vpop.permute.xlu1 %1975  ;;  %v2358_v57 = vcombine.low %v2302_v50, %v2318_v56  ;;  %v2359_v11 = vcombine.high %v2302_v50, %v2318_v56 }
 0x237   :  { %v2048_v24 = vrot.slane %v1976_v59, %v2681_v5  ;;  %v2044_v26 = vsel %vm431_vm0, %v2043_v44, %v2039_v52  ;;  %v2150_v49 = vmul.f32 0.14285715, %v2134_v3  ;;  %v2374_v6 = vcombine.low %v2309_v38, %v2325_v63 }
 0x238   :  { %v2122_v9 = vmul.f32 %v2044_v26, %v1968_v41  ;;  %v2123_v22 = vmul.f32 %v2044_v26, %v1972_v1  ;;  %v2375_v0 = vcombine.high %v2309_v38, %v2325_v63  ;;  %v2152_v5 = vmul.f32 0.14285715, %v2136_v30 }
 0x239   :  { %v2053_v42 = vsel %vm431_vm0, %v2052_v48, %v2048_v24  ;;  %v3489_v32 = vrot.slane %v2222_v46, %v2711_v29  ;;  %v2153_v1 = vmul.f32 0.14285715, %v2137_v61  ;;  %v2237_v36 = vrot.slane %v2223_v17, %v2711_v29 }
 0x23a   :  { %v2124_v2 = vmul.f32 %v2053_v42, %v1976_v59  ;;  %v2125_v35 = vmul.f32 %v2053_v42, %v1980_v25  ;;  %v2138_v12 = vadd.f32 %v2122_v9, %v3431_v53  ;;  %v2139_v7 = vadd.f32 %v2123_v22, %v3428_v34 }
 0x23b   :  { %v3493_v53 = vrot.slane %v2358_v57, %v2711_v29  ;;  %v2373_v34 = vrot.slane %v2359_v11, %v2711_v29  ;;  %v2246_v43 = vrot.slane %v2238_v47, %v2711_v29  ;;  %v2253_v16 = vrot.slane %v2239_v40, %v2711_v29 }
 0x23c   :  { %v2140_v54 = vadd.f32 %v2124_v2, %v3440_v21  ;;  %v2141_v37 = vadd.f32 %v2125_v35, %v3436_v27  ;;  %v2154_v58 = vmul.f32 0.14285715, %v2138_v12  ;;  %v2155_v51 = vmul.f32 0.14285715, %v2139_v7 }
 0x23d   :  { %v2382_v18 = vrot.slane %v2374_v6, %v2711_v29  ;;  %v2389_v56 = vrot.slane %v2375_v0, %v2711_v29 }
 0x23e   :  { %v2156_v13 = vmul.f32 0.14285715, %v2140_v54  ;;  %v2157_v23 = vmul.f32 0.14285715, %v2141_v37  ;;  %v2190_v14 = vcombine.low %v2150_v49, %v2154_v58  ;;  %v2191_v4 = vcombine.high %v2150_v49, %v2154_v58 }
 0x23f   :  { %v2326_v21 = vcombine.low %v2151_v28, %v2155_v51  ;;  %v2327_v19 = vcombine.high %v2151_v28, %v2155_v51 }
 0x240   :  { %v2206_v27 = vcombine.low %v2152_v5, %v2156_v13  ;;  %v2207_v44 = vcombine.high %v2152_v5, %v2156_v13  ;;  %v2342_v33 = vcombine.low %v2153_v1, %v2157_v23  ;;  %v2343_v55 = vcombine.high %v2153_v1, %v2157_v23 }
 0x241   :  { %v2198_v31 = vrot.slane %v2190_v14, %v2702_v20  ;;  %v2205_v10 = vrot.slane %v2191_v4, %v2702_v20  ;;  %v2334_v45 = vrot.slane %v2326_v21, %v2702_v20  ;;  %v2341_v62 = vrot.slane %v2327_v19, %v2702_v20 }
 0x242   :  { %v2214_v3 = vrot.slane %v2206_v27, %v2702_v20  ;;  %v2221_v15 = vrot.slane %v2207_v44, %v2702_v20  ;;  %v2350_v60 = vrot.slane %v2342_v33, %v2702_v20  ;;  %v2357_v41 = vrot.slane %v2343_v55, %v2702_v20 }
 0x244   :  { %v2254_v25 = vcombine.low %v2198_v31, %v2214_v3  ;;  %v2255_v50 = vcombine.high %v2198_v31, %v2214_v3  ;;  %v2270_v63 = vcombine.low %v2205_v10, %v2221_v15  ;;  %v2271_v39 = vcombine.high %v2205_v10, %v2221_v15 }
 0x245   :  { %v2390_v8 = vcombine.low %v2334_v45, %v2350_v60  ;;  %v2391_v46 = vcombine.high %v2334_v45, %v2350_v60  ;;  %v2406_v17 = vcombine.low %v2341_v62, %v2357_v41  ;;  %v2407_v47 = vcombine.high %v2341_v62, %v2357_v41 }
 0x246   :  { %v2262_v40 = vrot.slane %v2254_v25, %v2711_v29  ;;  %v2269_v30 = vrot.slane %v2255_v50, %v2711_v29  ;;  %v2278_v61 = vrot.slane %v2270_v63, %v2711_v29  ;;  %v2285_v20 = vrot.slane %v2271_v39, %v2711_v29 }
 0x247   :  { %v2398_v52 = vrot.slane %v2390_v8, %v2711_v29  ;;  %v2405_v59 = vrot.slane %v2391_v46, %v2711_v29  ;;  %v2414_v57 = vrot.slane %v2406_v17, %v2711_v29  ;;  %v2421_v48 = vrot.slane %v2407_v47, %v2711_v29 }
 0x248   :  { %v2287_v24 = vcombine.high %v3489_v32, %v2262_v40  ;;  %v2288_v11 = vcombine.low %v2237_v36, %v2269_v30  ;;  %v2289_v38 = vcombine.high %v2237_v36, %v2269_v30  ;;  %v2290_v26 = vcombine.low %v2246_v43, %v2278_v61 }
 0x249   :  { %v2423_v9 = vcombine.high %v3493_v53, %v2398_v52  ;;  %v2424_v22 = vcombine.low %v2373_v34, %v2405_v59  ;;  %v2425_v42 = vcombine.high %v2373_v34, %v2405_v59  ;;  %v2426_v49 = vcombine.low %v2382_v18, %v2414_v57 }
 0x24a   :  { %2431 = vrot.lane.b32.xlu1 %v2287_v24, %s2629_s29  ;;  %v2427_v2 = vcombine.high %v2382_v18, %v2414_v57  ;;  %v2291_v35 = vcombine.high %v2246_v43, %v2278_v61  ;;  %v2428_v6 = vcombine.low %v2389_v56, %v2421_v48  ;;  %v2292_v28 = vcombine.low %v2253_v16, %v2285_v20 }
 0x24b   :  { %2459 = vrot.lane.b32.xlu0 %v2423_v9, %s2629_s29  ;;  %v2429_v12 = vcombine.high %v2389_v56, %v2421_v48  ;;  %v2293_v29 = vcombine.high %v2253_v16, %v2285_v20  ;;  %v2422_v7 = vcombine.low %v3493_v53, %v2398_v52  ;;  %v2286_v0 = vcombine.low %v3489_v32, %v2262_v40 }
 0x24e   :  { %2435 = vrot.lane.b32.xlu1 %v2288_v11, %s2627_s27 }
 0x24f   :  { %2463 = vrot.lane.b32.xlu0 %v2424_v22, %s2627_s27 }
 0x252   :  { %2439 = vrot.lane.b32.xlu1 %v2289_v38, %s2625_s25 }
 0x253   :  { %2467 = vrot.lane.b32.xlu0 %v2425_v42, %s2625_s25 }
 0x256   :  { %2443 = vrot.lane.b32.xlu1 %v2290_v26, %s2623_s23 }
 0x257   :  { %2471 = vrot.lane.b32.xlu0 %v2426_v49, %s2623_s23 }
 0x25a   :  { %2447 = vrot.lane.b32.xlu1 %v2291_v35, %s2620_s22 }
 0x25b   :  { %2475 = vrot.lane.b32.xlu0 %v2427_v2, %s2620_s22 }
 0x25e   :  { %2451 = vrot.lane.b32.xlu1 %v2292_v28, %s2618_s20 }
 0x25f   :  { %2479 = vrot.lane.b32.xlu0 %v2428_v6, %s2618_s20 }
 0x262   :  { %2455 = vrot.lane.b32.xlu1 %v2293_v29, %s2619_s21 }
 0x263   :  { %2483 = vrot.lane.b32.xlu0 %v2429_v12, %s2619_s21 }
 0x2bc   :  { %v2432_v5 = vpop.permute.xlu1 %2431 }
 0x2bd   :  { %v2460_v54 = vpop.permute.xlu0 %2459  ;;  %v2487_v53 = vsel %vm2486_vm1, %v2286_v0, %v2432_v5 }
 0x2be   :  { %v2500_v34 = vsel %vm2486_vm1, %v2422_v7, %v2460_v54 }
 0x2c0   :  { %v2436_v37 = vpop.permute.xlu1 %2435 }
 0x2c1   :  { %v2464_v32 = vpop.permute.xlu0 %2463  ;;  %v2489_v14 = vsel %vm2488_vm2, %v2487_v53, %v2436_v37 }
 0x2c2   :  { %v2501_v21 = vsel %vm2488_vm2, %v2500_v34, %v2464_v32 }
 0x2c4   :  { %v2440_v1 = vpop.permute.xlu1 %2439 }
 0x2c5   :  { %v2468_v58 = vpop.permute.xlu0 %2467  ;;  %v2491_v19 = vsel %vm2490_vm3, %v2489_v14, %v2440_v1 }
 0x2c6   :  { %v2502_v44 = vsel %vm2490_vm3, %v2501_v21, %v2468_v58 }
 0x2c8   :  { %v2444_v51 = vpop.permute.xlu1 %2443 }
 0x2c9   :  { %v2472_v36 = vpop.permute.xlu0 %2471  ;;  %v2493_v33 = vsel %vm2492_vm4, %v2491_v19, %v2444_v51 }
 0x2ca   :  { %v2503_v55 = vsel %vm2492_vm4, %v2502_v44, %v2472_v36 }
 0x2cc   :  { %v2448_v13 = vpop.permute.xlu1 %2447 }
 0x2cd   :  { %v2476_v23 = vpop.permute.xlu0 %2475  ;;  %v2495_v31 = vsel %vm2494_vm5, %v2493_v33, %v2448_v13 }
 0x2ce   :  { %v2504_v10 = vsel %vm2494_vm5, %v2503_v55, %v2476_v23 }
 0x2d0   :  { %v2452_v4 = vpop.permute.xlu1 %2451 }
 0x2d1   :  { %v2480_v27 = vpop.permute.xlu0 %2479  ;;  %v2497_v43 = vsel %vm2496_vm6, %v2495_v31, %v2452_v4 }
 0x2d2   :  { %v2505_v3 = vsel %vm2496_vm6, %v2504_v10, %v2480_v27 }
 0x2d4   :  { %v2456_v16 = vpop.permute.xlu1 %2455 }
 0x2d5   :  { %v2484_v15 = vpop.permute.xlu0 %2483  ;;  %v2499_v60 = vsel %vm2498_vm7, %v2497_v43, %v2456_v16 }
 0x2d6   :  { %v2506_v41 = vsel %vm2498_vm7, %v2505_v3, %v2484_v15  ;;  %2507 = vst [vmem:[#allocation5] sm:$0xff] %v2499_v60 }
 0x2d7   :  { %2508 = vst [vmem:[#allocation5 + $0x8] sm:$0xff] %v2506_v41 }
 0x2d8   :  { %2600 = shalt.err (!%p2597_p12)
}
 0x2d9   :  { %s2601_s8 = scalar_lea.hbm %s3547_s1, 256 }
 0x2da   :  { %p2602_p13 = scmp.ne.s32.totalorder %s3547_s1, %s2601_s8  ;;  %p2605_p0 = scmp.lt.u32.totalorder %s2601_s8, %s3547_s1 }
 0x2dc   :  { %p2607_p1 = pnand %p2605_p0, %p2602_p13 }
 0x2de   :  { %2610 = shalt.err (!%p2607_p1)
}
 0x2df   :  { %2518 = dma.vmem_to_hbm [thread:$0]  %s2516_s4, 256, %s3547_s1, [#allocation4]  }
 0x2e0   :  { %2613 = dma.done.wait [#allocation4], 256  }
 0x2e1   :  { %2614 = vsyncadd [#allocation4], 4294967040 }
 0x2e2   :  { %2522 = vsyncpa [#allocation3], 1 }
 0x2e3   :  { %2523 = vsyncpa [#allocation4], 1 }

</bundles_post_ra>
